<compile_context>
chip_gen: v7x
topology: tpu7x:2x2x1
jax: 0.10.0
libtpu: 0.0.40
codegen_flags: <defaults>
</compile_context>

<pallas_src>
import functools
import math

import jax
import jax.numpy as jnp
from jax.experimental import pallas as pl
from jax.experimental.pallas import tpu as pltpu

# ---------------- config (small synthetic shapes) ----------------
B, L, H, F, D_OUT = 2, 8, 32, 64, 16       # batch, seq, hidden, ffn, text_feat_map out
VOCAB, MAX_POS, TYPE_VOCAB = 64, 16, 2
NUM_LAYERS = 2
LN_EPS = 1e-12


def _round_up(n, m):
    return ((n + m - 1) // m) * m


HP = _round_up(H, 128)        # lane-dense hidden
FP = _round_up(F, 128)        # lane-dense FFN dim
DP = _round_up(D_OUT, 128)    # lane-dense text_feat_map out dim
PW = max(HP, FP)              # packed 1-D-param width (HP == FP == 128 here)


# ---------------- fused Pallas kernel (single invocation, layers unrolled) ----------------

def fused_lm_kernel(emb_ref, bias2d_ref, mask_col_ref, emb_ln_ref,
                    qkv_w_ref, bqkv_ref, wo_ref, b1d_ref, w1_ref, w2_ref,
                    map_w_ref, map_b_ref,
                    hidden_ref, emb_out_ref,
                    *, n_layers, bl, h_real):
    hp = emb_ref.shape[-1]
    fp = w1_ref.shape[-1]
    inv_h = 1.0 / float(h_real)

    lane = jax.lax.broadcasted_iota(jnp.int32, (1, hp), 1)
    lane_mask = (lane < h_real).astype(jnp.float32)            # (1, HP), hoisted

    def masked_ln(x, g, b):
        # LayerNorm over the first h_real lanes only; pad lanes stay exactly 0
        # because gamma/beta are zero-padded.
        mu = jnp.sum(x, axis=-1, keepdims=True) * inv_h
        d = (x - mu) * lane_mask
        var = jnp.sum(d * d, axis=-1, keepdims=True) * inv_h
        return d * jax.lax.rsqrt(var + LN_EPS) * g + b

    # embedding LayerNorm -> activation kept as a value (vreg-resident) across layers
    x = masked_ln(emb_ref[...], emb_ln_ref[0:1, :], emb_ln_ref[1:2, :])    # (BL, HP) f32

    # flattened (BL, BL) additive attention bias: key mask + cross-batch block mask
    attn_bias = bias2d_ref[...][:, :bl]                                    # (BL, BL) f32

    for l in range(n_layers):                                  # statically unrolled
        xb = x.astype(jnp.bfloat16)
        b1d = b1d_ref[l]                                       # (8, PW) f32

        # --- fused Q|K|V projection (1/sqrt(H) pre-folded into the Q slice) ---
        qkv = (jnp.dot(xb, qkv_w_ref[l], preferred_element_type=jnp.float32)
               + bqkv_ref[l])                                  # (BL, 3*HP)
        q = qkv[:, 0 * hp:1 * hp].astype(jnp.bfloat16)
        k = qkv[:, 1 * hp:2 * hp].astype(jnp.bfloat16)
        v = qkv[:, 2 * hp:3 * hp].astype(jnp.bfloat16)

        # --- flattened 2-D attention (cross-batch pairs carry -1e4 in attn_bias) ---
        scores = jax.lax.dot_general(q, k, (((1,), (1,)), ((), ())),
                                     preferred_element_type=jnp.float32)  # (BL, BL)
        scores = scores + attn_bias
        scores = scores - jnp.max(scores, axis=-1, keepdims=True)
        p = jnp.exp(scores)
        p = p * pl.reciprocal(jnp.sum(p, axis=-1, keepdims=True), approx=True)

        ctx = jnp.dot(p.astype(jnp.bfloat16), v,
                      preferred_element_type=jnp.float32)                  # (BL, HP)
        attn = (jnp.dot(ctx.astype(jnp.bfloat16), wo_ref[l],
                        preferred_element_type=jnp.float32) + b1d[0:1, :hp])
        h1 = masked_ln(x + attn, b1d[1:2, :hp], b1d[2:3, :hp])

        # --- FFN ---
        ffn = (jnp.dot(h1.astype(jnp.bfloat16), w1_ref[l],
                       preferred_element_type=jnp.float32) + b1d[3:4, :fp])
        # TODO(synk): HF BERT uses exact (erf) GELU; tanh approximation kept for guaranteed lowering.
        ffn = jax.nn.gelu(ffn, approximate=True)
        ffn = (jnp.dot(ffn.astype(jnp.bfloat16), w2_ref[l],
                       preferred_element_type=jnp.float32) + b1d[4:5, :hp])
        x = masked_ln(h1 + ffn, b1d[5:6, :hp], b1d[6:7, :hp])

    # --- outputs: last hidden state + text_feat_map(hidden * mask) ---
    hidden_ref[...] = x
    masked = (x * mask_col_ref[...]).astype(jnp.bfloat16)
    emb_out_ref[...] = (jnp.dot(masked, map_w_ref[...],
                                preferred_element_type=jnp.float32) + map_b_ref[...])


# ---------------- wrapper (forward) ----------------

def language_model_forward(packed, input_ids, attention_mask, position_ids,
                           token_type_ids):
    # Embedding gathers are glue (data-dependent gather stays in plain JAX).
    emb = (packed['word_emb'][input_ids]
           + packed['pos_emb'][position_ids]
           + packed['type_emb'][token_type_ids]).astype(jnp.float32)      # (B, L, H)
    Bn, Ln, Hn = emb.shape
    BL = Bn * Ln
    emb_p = jnp.pad(emb, ((0, 0), (0, 0), (0, HP - Hn))).reshape(BL, HP)

    # Flattened (BL, BL) additive attention bias: per-key mask bias within a batch element,
    # -1e4 for cross-batch pairs (forbids mixing batches in the flattened softmax).
    mask_f = attention_mask.astype(jnp.float32)                            # (B, L)
    key_bias = ((1.0 - mask_f) * (-10000.0)).reshape(BL)                   # (BL,)
    batch_ids = jnp.repeat(jnp.arange(Bn, dtype=jnp.int32), Ln)            # (BL,)
    same_batch = batch_ids[:, None] == batch_ids[None, :]                  # (BL, BL)
    bias2d = jnp.where(same_batch, key_bias[None, :], jnp.float32(-10000.0))
    bias_w = _round_up(BL, 128)
    bias2d_p = jnp.pad(bias2d, ((0, 0), (0, bias_w - BL)))                 # lane-dense slab
    mask_col = mask_f.reshape(BL, 1)                                       # (B*L, 1)

    nl = packed['qkv_w'].shape[0]
    kernel = functools.partial(fused_lm_kernel, n_layers=nl, bl=BL, h_real=Hn)

    hidden_p, embedded_p = pl.pallas_call(
        kernel,
        out_shape=(jax.ShapeDtypeStruct((BL, HP), jnp.float32),
                   jax.ShapeDtypeStruct((BL, DP), jnp.float32)),
        grid=(1,),                                               # single step: no per-layer grid
        in_specs=[
            pl.BlockSpec((BL, HP), lambda l: (0, 0)),            # embeddings
            pl.BlockSpec((BL, bias_w), lambda l: (0, 0)),        # flattened attention bias
            pl.BlockSpec((BL, 1), lambda l: (0, 0)),             # token mask (column form)
            pl.BlockSpec((2, HP), lambda l: (0, 0)),             # embedding LN gamma/beta
            pl.BlockSpec((nl, HP, 3 * HP), lambda l: (0, 0, 0)), # fused wq|wk|wv (all layers)
            pl.BlockSpec((nl, 1, 3 * HP), lambda l: (0, 0, 0)),  # fused bq|bk|bv (all layers)
            pl.BlockSpec((nl, HP, HP), lambda l: (0, 0, 0)),     # wo (all layers)
            pl.BlockSpec((nl, 8, PW), lambda l: (0, 0, 0)),      # packed 1-D params (all layers)
            pl.BlockSpec((nl, HP, FP), lambda l: (0, 0, 0)),     # w1 (all layers)
            pl.BlockSpec((nl, FP, HP), lambda l: (0, 0, 0)),     # w2 (all layers)
            pl.BlockSpec((HP, DP), lambda l: (0, 0)),            # text_feat_map W
            pl.BlockSpec((1, DP), lambda l: (0, 0)),             # text_feat_map b
        ],
        out_specs=(pl.BlockSpec((BL, HP), lambda l: (0, 0)),     # hidden
                   pl.BlockSpec((BL, DP), lambda l: (0, 0))),    # embedded
        compiler_params=pltpu.CompilerParams(dimension_semantics=("arbitrary",)),
    )(emb_p, bias2d_p, mask_col, packed['emb_ln'],
      packed['qkv_w'], packed['bqkv'], packed['wo'], packed['b1d'],
      packed['w1'], packed['w2'], packed['map_w'], packed['map_b'])

    hidden = hidden_p[:, :Hn].reshape(Bn, Ln, Hn)
    embedded = embedded_p[:, :D_OUT].reshape(Bn, Ln, D_OUT)
    masks = attention_mask
    return embedded, masks, hidden


# ---------------- parameter init (original layout) & packing ----------------

def init_params(key):
    ks = iter(jax.random.split(key, 40))

    def dense(kin, kout):
        return 0.02 * jax.random.normal(next(ks), (kin, kout), jnp.float32)

    def bias(n):
        return jnp.zeros((1, n), jnp.float32)

    params = {
        'word_emb': 0.02 * jax.random.normal(next(ks), (VOCAB, H), jnp.float32),
        'pos_emb': 0.02 * jax.random.normal(next(ks), (MAX_POS, H), jnp.float32),
        'type_emb': 0.02 * jax.random.normal(next(ks), (TYPE_VOCAB, H), jnp.float32),
        'emb_ln_g': jnp.ones((1, H), jnp.float32),
        'emb_ln_b': jnp.zeros((1, H), jnp.float32),
        'layers': [],
        'map_w': dense(H, D_OUT),
        'map_b': bias(D_OUT),
    }
    for _ in range(NUM_LAYERS):
        params['layers'].append({
            'wq': dense(H, H), 'bq': bias(H),
            'wk': dense(H, H), 'bk': bias(H),
            'wv': dense(H, H), 'bv': bias(H),
            'wo': dense(H, H), 'bo': bias(H),
            'ln1_g': jnp.ones((1, H), jnp.float32), 'ln1_b': jnp.zeros((1, H), jnp.float32),
            'w1': dense(H, F), 'b1': bias(F),
            'w2': dense(F, H), 'b2': bias(H),
            'ln2_g': jnp.ones((1, H), jnp.float32), 'ln2_b': jnp.zeros((1, H), jnp.float32),
        })
    return params


def pack_params(params):
    """Pad to lane-dense 128 widths, fold 1/sqrt(H) into wq/bq, fuse Q|K|V along the output
    lane axis, stack per-layer weights with a leading layer axis, pack the remaining 1-D
    per-layer params into one (8, PW) slab, and cast matmul weights to bf16."""
    inv_sqrt_h = 1.0 / math.sqrt(H)

    def pad2(w, rows, cols):
        return jnp.zeros((rows, cols), jnp.float32).at[:w.shape[0], :w.shape[1]].set(w)

    def pad1(v, cols):
        return jnp.zeros((1, cols), jnp.float32).at[:, :v.shape[1]].set(v)

    qkv_ws, bqkvs, wos, b1ds, w1s, w2s = [], [], [], [], [], []
    for lp in params['layers']:
        qkv_ws.append(jnp.concatenate([
            pad2(lp['wq'] * inv_sqrt_h, HP, HP),        # 1/sqrt(H) folded into Q slice
            pad2(lp['wk'], HP, HP),
            pad2(lp['wv'], HP, HP),
        ], axis=1))                                      # (HP, 3*HP)
        bqkvs.append(jnp.concatenate([
            pad1(lp['bq'] * inv_sqrt_h, HP), pad1(lp['bk'], HP), pad1(lp['bv'], HP),
        ], axis=1))                                      # (1, 3*HP)
        wos.append(pad2(lp['wo'], HP, HP))
        w1s.append(pad2(lp['w1'], HP, FP))
        w2s.append(pad2(lp['w2'], FP, HP))
        b1ds.append(jnp.concatenate([
            pad1(lp['bo'], PW), pad1(lp['ln1_g'], PW), pad1(lp['ln1_b'], PW),
            pad1(lp['b1'], PW), pad1(lp['b2'], PW),
            pad1(lp['ln2_g'], PW), pad1(lp['ln2_b'], PW),
            jnp.zeros((1, PW), jnp.float32),             # pad to 8 sublanes
        ], axis=0))                                      # (8, PW)

    return {
        'word_emb': params['word_emb'],
        'pos_emb': params['pos_emb'],
        'type_emb': params['type_emb'],
        'emb_ln': jnp.concatenate([pad1(params['emb_ln_g'], HP),
                                   pad1(params['emb_ln_b'], HP)], axis=0),   # (2, HP)
        'qkv_w': jnp.stack(qkv_ws).astype(jnp.bfloat16),                     # (NL, HP, 3*HP)
        'bqkv': jnp.stack(bqkvs),                                            # (NL, 1, 3*HP) f32
        'wo': jnp.stack(wos).astype(jnp.bfloat16),                           # (NL, HP, HP)
        'b1d': jnp.stack(b1ds),                                              # (NL, 8, PW) f32
        'w1': jnp.stack(w1s).astype(jnp.bfloat16),                           # (NL, HP, FP)
        'w2': jnp.stack(w2s).astype(jnp.bfloat16),                           # (NL, FP, HP)
        'map_w': pad2(params['map_w'], HP, DP).astype(jnp.bfloat16),         # (HP, DP)
        'map_b': pad1(params['map_b'], DP),                                  # (1, DP)
    }


# ---------------- pure-JAX f32 reference (for validation only) ----------------

def _ln_ref(x, g, b):
    mu = jnp.mean(x, axis=-1, keepdims=True)
    var = jnp.mean((x - mu) ** 2, axis=-1, keepdims=True)
    return (x - mu) * jax.lax.rsqrt(var + LN_EPS) * g + b


def reference_forward(params, input_ids, attention_mask, position_ids, token_type_ids):
    emb = (params['word_emb'][input_ids] + params['pos_emb'][position_ids]
           + params['type_emb'][token_type_ids]).astype(jnp.float32)
    x = _ln_ref(emb, params['emb_ln_g'], params['emb_ln_b'])
    mask_f = attention_mask.astype(jnp.float32)
    bias = (1.0 - mask_f)[:, None, :] * (-10000.0)
    for lp in params['layers']:
        q = x @ lp['wq'] + lp['bq']
        k = x @ lp['wk'] + lp['bk']
        v = x @ lp['wv'] + lp['bv']
        s = jnp.einsum('bqd,bkd->bqk', q, k) / jnp.sqrt(jnp.float32(H)) + bias
        p = jax.nn.softmax(s, axis=-1)
        ctx = jnp.einsum('bqk,bkd->bqd', p, v)
        attn = ctx @ lp['wo'] + lp['bo']
        h1 = _ln_ref(x + attn, lp['ln1_g'], lp['ln1_b'])
        ffn = jax.nn.gelu(h1 @ lp['w1'] + lp['b1'], approximate=True)
        ffn = ffn @ lp['w2'] + lp['b2']
        x = _ln_ref(h1 + ffn, lp['ln2_g'], lp['ln2_b'])
    hidden = x
    embedded = (hidden * mask_f[..., None]) @ params['map_w'] + params['map_b']
    return embedded, attention_mask, hidden


if __name__ == "__main__":
    key = jax.random.PRNGKey(0)
    params = init_params(key)
    packed = pack_params(params)

    k_ids, _ = jax.random.split(key)
    input_ids = jax.random.randint(k_ids, (B, L), 0, VOCAB, dtype=jnp.int32)
    lengths = jnp.array([6, 4], dtype=jnp.int32)
    attention_mask = (jnp.arange(L, dtype=jnp.int32)[None, :] < lengths[:, None]
                      ).astype(jnp.int32)
    position_ids = jnp.broadcast_to(jnp.arange(L, dtype=jnp.int32), (B, L))
    token_type_ids = jnp.zeros((B, L), dtype=jnp.int32)

    fwd = jax.jit(language_model_forward)
    embedded, masks, hidden = fwd(packed, input_ids, attention_mask,
                                  position_ids, token_type_ids)
    jax.block_until_ready((embedded, masks, hidden))

    assert embedded.shape == (B, L, D_OUT) and embedded.dtype == jnp.float32
    assert masks.shape == (B, L)
    assert hidden.shape == (B, L, H) and hidden.dtype == jnp.float32
    assert bool(jnp.all(jnp.isfinite(embedded))) and bool(jnp.all(jnp.isfinite(hidden)))

    # Numeric check vs pure-JAX f32 reference (loose tol: kernel uses bf16 MXU operands).
    ref_emb, _, ref_hid = reference_forward(params, input_ids, attention_mask,
                                            position_ids, token_type_ids)
    assert float(jnp.max(jnp.abs(hidden - ref_hid))) < 7.5e-2
    assert float(jnp.max(jnp.abs(embedded - ref_emb))) < 7.5e-2

    # TODO(synk): original wrapper also emits [DEBUG] prints of dict keys/shapes; omitted (no compute).
    print("KERNEL_OK")
</pallas_src>

<mosaic_0001>
module attributes {stable_mosaic.version = 11 : i64} {
  func.func @fused_lm_kernel(%arg0: i32, %arg1: memref<16x128xf32, #tpu.memory_space<vmem>>, %arg2: memref<16x128xf32, #tpu.memory_space<vmem>>, %arg3: memref<16x1xf32, #tpu.memory_space<vmem>>, %arg4: memref<2x128xf32, #tpu.memory_space<vmem>>, %arg5: memref<2x128x384xbf16, #tpu.memory_space<vmem>>, %arg6: memref<2x1x384xf32, #tpu.memory_space<vmem>>, %arg7: memref<2x128x128xbf16, #tpu.memory_space<vmem>>, %arg8: memref<2x8x128xf32, #tpu.memory_space<vmem>>, %arg9: memref<2x128x128xbf16, #tpu.memory_space<vmem>>, %arg10: memref<2x128x128xbf16, #tpu.memory_space<vmem>>, %arg11: memref<128x128xbf16, #tpu.memory_space<vmem>>, %arg12: memref<1x128xf32, #tpu.memory_space<vmem>>, %arg13: memref<16x128xf32, #tpu.memory_space<vmem>>, %arg14: memref<16x128xf32, #tpu.memory_space<vmem>>) attributes {dimension_semantics = [#tpu.dimension_semantics<arbitrary>], iteration_bounds = array<i64: 1>, scalar_prefetch = 0 : i64, scratch_operands = 0 : i64, tpu.core_type = #tpu.core_type<tc>, window_params = [{pipeline_mode = #tpu.pipeline_mode<synchronous>, transform_indices = @transform_0, window_bounds = array<i64: 16, 128>}, {pipeline_mode = #tpu.pipeline_mode<synchronous>, transform_indices = @transform_1, window_bounds = array<i64: 16, 128>}, {pipeline_mode = #tpu.pipeline_mode<synchronous>, transform_indices = @transform_2, window_bounds = array<i64: 16, 1>}, {pipeline_mode = #tpu.pipeline_mode<synchronous>, transform_indices = @transform_3, window_bounds = array<i64: 2, 128>}, {pipeline_mode = #tpu.pipeline_mode<synchronous>, transform_indices = @transform_4, window_bounds = array<i64: 2, 128, 384>}, {pipeline_mode = #tpu.pipeline_mode<synchronous>, transform_indices = @transform_5, window_bounds = array<i64: 2, 1, 384>}, {pipeline_mode = #tpu.pipeline_mode<synchronous>, transform_indices = @transform_6, window_bounds = array<i64: 2, 128, 128>}, {pipeline_mode = #tpu.pipeline_mode<synchronous>, transform_indices = @transform_7, window_bounds = array<i64: 2, 8, 128>}, {pipeline_mode = #tpu.pipeline_mode<synchronous>, transform_indices = @transform_8, window_bounds = array<i64: 2, 128, 128>}, {pipeline_mode = #tpu.pipeline_mode<synchronous>, transform_indices = @transform_9, window_bounds = array<i64: 2, 128, 128>}, {pipeline_mode = #tpu.pipeline_mode<synchronous>, transform_indices = @transform_10, window_bounds = array<i64: 128, 128>}, {pipeline_mode = #tpu.pipeline_mode<synchronous>, transform_indices = @transform_11, window_bounds = array<i64: 1, 128>}, {pipeline_mode = #tpu.pipeline_mode<synchronous>, transform_indices = @transform_12, window_bounds = array<i64: 16, 128>}, {pipeline_mode = #tpu.pipeline_mode<synchronous>, transform_indices = @transform_13, window_bounds = array<i64: 16, 128>}]} {
    %0 = tpu.iota {dimensions = array<i32: 1>} : vector<1x128xi32>
    %c32_i32 = arith.constant 32 : i32
    %1 = vector.broadcast %c32_i32 : i32 to vector<1x128xi32>
    %2 = arith.cmpi slt, %0, %1 : vector<1x128xi32>
    %3 = arith.extui %2 : vector<1x128xi1> to vector<1x128xi32>
    %4 = arith.sitofp %3 : vector<1x128xi32> to vector<1x128xf32>
    %c0 = arith.constant 0 : index
    %c0_0 = arith.constant 0 : index
    %5 = vector.load %arg1[%c0, %c0_0] : memref<16x128xf32, #tpu.memory_space<vmem>>, vector<16x128xf32>
    %c0_1 = arith.constant 0 : index
    %c0_2 = arith.constant 0 : index
    %6 = vector.load %arg4[%c0_1, %c0_2] : memref<2x128xf32, #tpu.memory_space<vmem>>, vector<1x128xf32>
    %c1 = arith.constant 1 : index
    %c0_3 = arith.constant 0 : index
    %7 = vector.load %arg4[%c1, %c0_3] : memref<2x128xf32, #tpu.memory_space<vmem>>, vector<1x128xf32>
    %cst = arith.constant dense<0.000000e+00> : vector<16xf32>
    %8 = vector.multi_reduction <add>, %5, %cst [1] : vector<16x128xf32> to vector<16xf32>
    %9 = vector.shape_cast %8 : vector<16xf32> to vector<16x1xf32>
    %cst_4 = arith.constant 3.125000e-02 : f32
    %10 = vector.broadcast %cst_4 : f32 to vector<16x1xf32>
    %11 = arith.mulf %9, %10 : vector<16x1xf32>
    %12 = vector.broadcast %11 : vector<16x1xf32> to vector<16x128xf32>
    %13 = arith.subf %5, %12 : vector<16x128xf32>
    %14 = vector.broadcast %4 : vector<1x128xf32> to vector<16x128xf32>
    %15 = arith.mulf %13, %14 : vector<16x128xf32>
    %16 = arith.mulf %15, %15 : vector<16x128xf32>
    %cst_5 = arith.constant dense<0.000000e+00> : vector<16xf32>
    %17 = vector.multi_reduction <add>, %16, %cst_5 [1] : vector<16x128xf32> to vector<16xf32>
    %18 = vector.shape_cast %17 : vector<16xf32> to vector<16x1xf32>
    %cst_6 = arith.constant 3.125000e-02 : f32
    %19 = vector.broadcast %cst_6 : f32 to vector<16x1xf32>
    %20 = arith.mulf %18, %19 : vector<16x1xf32>
    %cst_7 = arith.constant 9.99999996E-13 : f32
    %21 = vector.broadcast %cst_7 : f32 to vector<16x1xf32>
    %22 = arith.addf %20, %21 : vector<16x1xf32>
    %23 = math.rsqrt %22 : vector<16x1xf32>
    %24 = vector.broadcast %23 : vector<16x1xf32> to vector<16x128xf32>
    %25 = arith.mulf %15, %24 : vector<16x128xf32>
    %26 = vector.broadcast %6 : vector<1x128xf32> to vector<16x128xf32>
    %27 = arith.mulf %25, %26 : vector<16x128xf32>
    %28 = vector.broadcast %7 : vector<1x128xf32> to vector<16x128xf32>
    %29 = arith.addf %27, %28 : vector<16x128xf32>
    %c0_8 = arith.constant 0 : index
    %c0_9 = arith.constant 0 : index
    %30 = vector.load %arg2[%c0_8, %c0_9] : memref<16x128xf32, #tpu.memory_space<vmem>>, vector<16x128xf32>
    %31 = vector.extract_strided_slice %30 {offsets = [0, 0], sizes = [16, 16], strides = [1, 1]} : vector<16x128xf32> to vector<16x16xf32>
    %32 = arith.truncf %29 : vector<16x128xf32> to vector<16x128xbf16>
    %c0_10 = arith.constant 0 : index
    %c0_11 = arith.constant 0 : index
    %c0_12 = arith.constant 0 : index
    %33 = vector.load %arg8[%c0_10, %c0_11, %c0_12] : memref<2x8x128xf32, #tpu.memory_space<vmem>>, vector<1x8x128xf32>
    %34 = vector.shape_cast %33 : vector<1x8x128xf32> to vector<8x128xf32>
    %c0_13 = arith.constant 0 : index
    %c0_14 = arith.constant 0 : index
    %c0_15 = arith.constant 0 : index
    %35 = vector.load %arg5[%c0_13, %c0_14, %c0_15] : memref<2x128x384xbf16, #tpu.memory_space<vmem>>, vector<1x128x384xbf16>
    %36 = vector.shape_cast %35 : vector<1x128x384xbf16> to vector<128x384xbf16>
    %cst_16 = arith.constant dense<0.000000e+00> : vector<16x384xf32>
    %37 = tpu.matmul %32, %36, %cst_16 {dimension_numbers = #tpu.dot_dimension_numbers<[1], [0], [0], [1], [0, 0, 1, 1], [], []>} : vector<16x128xbf16>, vector<128x384xbf16>, vector<16x384xf32> -> vector<16x384xf32>
    %c0_17 = arith.constant 0 : index
    %c0_18 = arith.constant 0 : index
    %c0_19 = arith.constant 0 : index
    %38 = vector.load %arg6[%c0_17, %c0_18, %c0_19] : memref<2x1x384xf32, #tpu.memory_space<vmem>>, vector<1x1x384xf32>
    %39 = vector.shape_cast %38 : vector<1x1x384xf32> to vector<1x384xf32>
    %40 = vector.broadcast %39 : vector<1x384xf32> to vector<16x384xf32>
    %41 = arith.addf %37, %40 : vector<16x384xf32>
    %42 = vector.extract_strided_slice %41 {offsets = [0, 0], sizes = [16, 128], strides = [1, 1]} : vector<16x384xf32> to vector<16x128xf32>
    %43 = arith.truncf %42 : vector<16x128xf32> to vector<16x128xbf16>
    %44 = vector.extract_strided_slice %41 {offsets = [0, 128], sizes = [16, 128], strides = [1, 1]} : vector<16x384xf32> to vector<16x128xf32>
    %45 = arith.truncf %44 : vector<16x128xf32> to vector<16x128xbf16>
    %46 = vector.extract_strided_slice %41 {offsets = [0, 256], sizes = [16, 128], strides = [1, 1]} : vector<16x384xf32> to vector<16x128xf32>
    %47 = arith.truncf %46 : vector<16x128xf32> to vector<16x128xbf16>
    %cst_20 = arith.constant dense<0.000000e+00> : vector<16x16xf32>
    %48 = tpu.matmul %43, %45, %cst_20 {dimension_numbers = #tpu.dot_dimension_numbers<[1], [1], [0], [0], [0, 0, 1, 0], [], []>} : vector<16x128xbf16>, vector<16x128xbf16>, vector<16x16xf32> -> vector<16x16xf32>
    %49 = arith.addf %48, %31 : vector<16x16xf32>
    %cst_21 = arith.constant dense<0xFF800000> : vector<16xf32>
    %50 = vector.multi_reduction <maximumf>, %49, %cst_21 [1] : vector<16x16xf32> to vector<16xf32>
    %51 = vector.shape_cast %50 : vector<16xf32> to vector<16x1xf32>
    %52 = vector.broadcast %51 : vector<16x1xf32> to vector<16x16xf32>
    %53 = arith.subf %49, %52 : vector<16x16xf32>
    %54 = math.exp %53 : vector<16x16xf32>
    %cst_22 = arith.constant dense<0.000000e+00> : vector<16xf32>
    %55 = vector.multi_reduction <add>, %54, %cst_22 [1] : vector<16x16xf32> to vector<16xf32>
    %56 = vector.shape_cast %55 : vector<16xf32> to vector<16x1xf32>
    %57 = tpu.reciprocal %56 {approx = true} : vector<16x1xf32> -> vector<16x1xf32>
    %58 = vector.broadcast %57 : vector<16x1xf32> to vector<16x16xf32>
    %59 = arith.mulf %54, %58 : vector<16x16xf32>
    %60 = arith.truncf %59 : vector<16x16xf32> to vector<16x16xbf16>
    %cst_23 = arith.constant dense<0.000000e+00> : vector<16x128xf32>
    %61 = tpu.matmul %60, %47, %cst_23 {dimension_numbers = #tpu.dot_dimension_numbers<[1], [0], [0], [1], [0, 0, 1, 1], [], []>} : vector<16x16xbf16>, vector<16x128xbf16>, vector<16x128xf32> -> vector<16x128xf32>
    %62 = arith.truncf %61 : vector<16x128xf32> to vector<16x128xbf16>
    %c0_24 = arith.constant 0 : index
    %c0_25 = arith.constant 0 : index
    %c0_26 = arith.constant 0 : index
    %63 = vector.load %arg7[%c0_24, %c0_25, %c0_26] : memref<2x128x128xbf16, #tpu.memory_space<vmem>>, vector<1x128x128xbf16>
    %64 = vector.shape_cast %63 : vector<1x128x128xbf16> to vector<128x128xbf16>
    %cst_27 = arith.constant dense<0.000000e+00> : vector<16x128xf32>
    %65 = tpu.matmul %62, %64, %cst_27 {dimension_numbers = #tpu.dot_dimension_numbers<[1], [0], [0], [1], [0, 0, 1, 1], [], []>} : vector<16x128xbf16>, vector<128x128xbf16>, vector<16x128xf32> -> vector<16x128xf32>
    %66 = vector.extract_strided_slice %34 {offsets = [0, 0], sizes = [1, 128], strides = [1, 1]} : vector<8x128xf32> to vector<1x128xf32>
    %67 = vector.broadcast %66 : vector<1x128xf32> to vector<16x128xf32>
    %68 = arith.addf %65, %67 : vector<16x128xf32>
    %69 = arith.addf %29, %68 : vector<16x128xf32>
    %70 = vector.extract_strided_slice %34 {offsets = [1, 0], sizes = [1, 128], strides = [1, 1]} : vector<8x128xf32> to vector<1x128xf32>
    %71 = vector.extract_strided_slice %34 {offsets = [2, 0], sizes = [1, 128], strides = [1, 1]} : vector<8x128xf32> to vector<1x128xf32>
    %cst_28 = arith.constant dense<0.000000e+00> : vector<16xf32>
    %72 = vector.multi_reduction <add>, %69, %cst_28 [1] : vector<16x128xf32> to vector<16xf32>
    %73 = vector.shape_cast %72 : vector<16xf32> to vector<16x1xf32>
    %cst_29 = arith.constant 3.125000e-02 : f32
    %74 = vector.broadcast %cst_29 : f32 to vector<16x1xf32>
    %75 = arith.mulf %73, %74 : vector<16x1xf32>
    %76 = vector.broadcast %75 : vector<16x1xf32> to vector<16x128xf32>
    %77 = arith.subf %69, %76 : vector<16x128xf32>
    %78 = vector.broadcast %4 : vector<1x128xf32> to vector<16x128xf32>
    %79 = arith.mulf %77, %78 : vector<16x128xf32>
    %80 = arith.mulf %79, %79 : vector<16x128xf32>
    %cst_30 = arith.constant dense<0.000000e+00> : vector<16xf32>
    %81 = vector.multi_reduction <add>, %80, %cst_30 [1] : vector<16x128xf32> to vector<16xf32>
    %82 = vector.shape_cast %81 : vector<16xf32> to vector<16x1xf32>
    %cst_31 = arith.constant 3.125000e-02 : f32
    %83 = vector.broadcast %cst_31 : f32 to vector<16x1xf32>
    %84 = arith.mulf %82, %83 : vector<16x1xf32>
    %cst_32 = arith.constant 9.99999996E-13 : f32
    %85 = vector.broadcast %cst_32 : f32 to vector<16x1xf32>
    %86 = arith.addf %84, %85 : vector<16x1xf32>
    %87 = math.rsqrt %86 : vector<16x1xf32>
    %88 = vector.broadcast %87 : vector<16x1xf32> to vector<16x128xf32>
    %89 = arith.mulf %79, %88 : vector<16x128xf32>
    %90 = vector.broadcast %70 : vector<1x128xf32> to vector<16x128xf32>
    %91 = arith.mulf %89, %90 : vector<16x128xf32>
    %92 = vector.broadcast %71 : vector<1x128xf32> to vector<16x128xf32>
    %93 = arith.addf %91, %92 : vector<16x128xf32>
    %94 = arith.truncf %93 : vector<16x128xf32> to vector<16x128xbf16>
    %c0_33 = arith.constant 0 : index
    %c0_34 = arith.constant 0 : index
    %c0_35 = arith.constant 0 : index
    %95 = vector.load %arg9[%c0_33, %c0_34, %c0_35] : memref<2x128x128xbf16, #tpu.memory_space<vmem>>, vector<1x128x128xbf16>
    %96 = vector.shape_cast %95 : vector<1x128x128xbf16> to vector<128x128xbf16>
    %cst_36 = arith.constant dense<0.000000e+00> : vector<16x128xf32>
    %97 = tpu.matmul %94, %96, %cst_36 {dimension_numbers = #tpu.dot_dimension_numbers<[1], [0], [0], [1], [0, 0, 1, 1], [], []>} : vector<16x128xbf16>, vector<128x128xbf16>, vector<16x128xf32> -> vector<16x128xf32>
    %98 = vector.extract_strided_slice %34 {offsets = [3, 0], sizes = [1, 128], strides = [1, 1]} : vector<8x128xf32> to vector<1x128xf32>
    %99 = vector.broadcast %98 : vector<1x128xf32> to vector<16x128xf32>
    %100 = arith.addf %97, %99 : vector<16x128xf32>
    %101 = arith.mulf %100, %100 : vector<16x128xf32>
    %102 = arith.mulf %100, %101 : vector<16x128xf32>
    %cst_37 = arith.constant 4.471500e-02 : f32
    %103 = vector.broadcast %cst_37 : f32 to vector<16x128xf32>
    %104 = arith.mulf %103, %102 : vector<16x128xf32>
    %105 = arith.addf %100, %104 : vector<16x128xf32>
    %cst_38 = arith.constant 0.797884583 : f32
    %106 = vector.broadcast %cst_38 : f32 to vector<16x128xf32>
    %107 = arith.mulf %106, %105 : vector<16x128xf32>
    %108 = math.tanh %107 : vector<16x128xf32>
    %cst_39 = arith.constant 1.000000e+00 : f32
    %109 = vector.broadcast %cst_39 : f32 to vector<16x128xf32>
    %110 = arith.addf %109, %108 : vector<16x128xf32>
    %cst_40 = arith.constant 5.000000e-01 : f32
    %111 = vector.broadcast %cst_40 : f32 to vector<16x128xf32>
    %112 = arith.mulf %111, %110 : vector<16x128xf32>
    %113 = arith.mulf %100, %112 : vector<16x128xf32>
    %114 = arith.truncf %113 : vector<16x128xf32> to vector<16x128xbf16>
    %c0_41 = arith.constant 0 : index
    %c0_42 = arith.constant 0 : index
    %c0_43 = arith.constant 0 : index
    %115 = vector.load %arg10[%c0_41, %c0_42, %c0_43] : memref<2x128x128xbf16, #tpu.memory_space<vmem>>, vector<1x128x128xbf16>
    %116 = vector.shape_cast %115 : vector<1x128x128xbf16> to vector<128x128xbf16>
    %cst_44 = arith.constant dense<0.000000e+00> : vector<16x128xf32>
    %117 = tpu.matmul %114, %116, %cst_44 {dimension_numbers = #tpu.dot_dimension_numbers<[1], [0], [0], [1], [0, 0, 1, 1], [], []>} : vector<16x128xbf16>, vector<128x128xbf16>, vector<16x128xf32> -> vector<16x128xf32>
    %118 = vector.extract_strided_slice %34 {offsets = [4, 0], sizes = [1, 128], strides = [1, 1]} : vector<8x128xf32> to vector<1x128xf32>
    %119 = vector.broadcast %118 : vector<1x128xf32> to vector<16x128xf32>
    %120 = arith.addf %117, %119 : vector<16x128xf32>
    %121 = arith.addf %93, %120 : vector<16x128xf32>
    %122 = vector.extract_strided_slice %34 {offsets = [5, 0], sizes = [1, 128], strides = [1, 1]} : vector<8x128xf32> to vector<1x128xf32>
    %123 = vector.extract_strided_slice %34 {offsets = [6, 0], sizes = [1, 128], strides = [1, 1]} : vector<8x128xf32> to vector<1x128xf32>
    %cst_45 = arith.constant dense<0.000000e+00> : vector<16xf32>
    %124 = vector.multi_reduction <add>, %121, %cst_45 [1] : vector<16x128xf32> to vector<16xf32>
    %125 = vector.shape_cast %124 : vector<16xf32> to vector<16x1xf32>
    %cst_46 = arith.constant 3.125000e-02 : f32
    %126 = vector.broadcast %cst_46 : f32 to vector<16x1xf32>
    %127 = arith.mulf %125, %126 : vector<16x1xf32>
    %128 = vector.broadcast %127 : vector<16x1xf32> to vector<16x128xf32>
    %129 = arith.subf %121, %128 : vector<16x128xf32>
    %130 = vector.broadcast %4 : vector<1x128xf32> to vector<16x128xf32>
    %131 = arith.mulf %129, %130 : vector<16x128xf32>
    %132 = arith.mulf %131, %131 : vector<16x128xf32>
    %cst_47 = arith.constant dense<0.000000e+00> : vector<16xf32>
    %133 = vector.multi_reduction <add>, %132, %cst_47 [1] : vector<16x128xf32> to vector<16xf32>
    %134 = vector.shape_cast %133 : vector<16xf32> to vector<16x1xf32>
    %cst_48 = arith.constant 3.125000e-02 : f32
    %135 = vector.broadcast %cst_48 : f32 to vector<16x1xf32>
    %136 = arith.mulf %134, %135 : vector<16x1xf32>
    %cst_49 = arith.constant 9.99999996E-13 : f32
    %137 = vector.broadcast %cst_49 : f32 to vector<16x1xf32>
    %138 = arith.addf %136, %137 : vector<16x1xf32>
    %139 = math.rsqrt %138 : vector<16x1xf32>
    %140 = vector.broadcast %139 : vector<16x1xf32> to vector<16x128xf32>
    %141 = arith.mulf %131, %140 : vector<16x128xf32>
    %142 = vector.broadcast %122 : vector<1x128xf32> to vector<16x128xf32>
    %143 = arith.mulf %141, %142 : vector<16x128xf32>
    %144 = vector.broadcast %123 : vector<1x128xf32> to vector<16x128xf32>
    %145 = arith.addf %143, %144 : vector<16x128xf32>
    %146 = arith.truncf %145 : vector<16x128xf32> to vector<16x128xbf16>
    %c1_50 = arith.constant 1 : index
    %c0_51 = arith.constant 0 : index
    %c0_52 = arith.constant 0 : index
    %147 = vector.load %arg8[%c1_50, %c0_51, %c0_52] : memref<2x8x128xf32, #tpu.memory_space<vmem>>, vector<1x8x128xf32>
    %148 = vector.shape_cast %147 : vector<1x8x128xf32> to vector<8x128xf32>
    %c1_53 = arith.constant 1 : index
    %c0_54 = arith.constant 0 : index
    %c0_55 = arith.constant 0 : index
    %149 = vector.load %arg5[%c1_53, %c0_54, %c0_55] : memref<2x128x384xbf16, #tpu.memory_space<vmem>>, vector<1x128x384xbf16>
    %150 = vector.shape_cast %149 : vector<1x128x384xbf16> to vector<128x384xbf16>
    %cst_56 = arith.constant dense<0.000000e+00> : vector<16x384xf32>
    %151 = tpu.matmul %146, %150, %cst_56 {dimension_numbers = #tpu.dot_dimension_numbers<[1], [0], [0], [1], [0, 0, 1, 1], [], []>} : vector<16x128xbf16>, vector<128x384xbf16>, vector<16x384xf32> -> vector<16x384xf32>
    %c1_57 = arith.constant 1 : index
    %c0_58 = arith.constant 0 : index
    %c0_59 = arith.constant 0 : index
    %152 = vector.load %arg6[%c1_57, %c0_58, %c0_59] : memref<2x1x384xf32, #tpu.memory_space<vmem>>, vector<1x1x384xf32>
    %153 = vector.shape_cast %152 : vector<1x1x384xf32> to vector<1x384xf32>
    %154 = vector.broadcast %153 : vector<1x384xf32> to vector<16x384xf32>
    %155 = arith.addf %151, %154 : vector<16x384xf32>
    %156 = vector.extract_strided_slice %155 {offsets = [0, 0], sizes = [16, 128], strides = [1, 1]} : vector<16x384xf32> to vector<16x128xf32>
    %157 = arith.truncf %156 : vector<16x128xf32> to vector<16x128xbf16>
    %158 = vector.extract_strided_slice %155 {offsets = [0, 128], sizes = [16, 128], strides = [1, 1]} : vector<16x384xf32> to vector<16x128xf32>
    %159 = arith.truncf %158 : vector<16x128xf32> to vector<16x128xbf16>
    %160 = vector.extract_strided_slice %155 {offsets = [0, 256], sizes = [16, 128], strides = [1, 1]} : vector<16x384xf32> to vector<16x128xf32>
    %161 = arith.truncf %160 : vector<16x128xf32> to vector<16x128xbf16>
    %cst_60 = arith.constant dense<0.000000e+00> : vector<16x16xf32>
    %162 = tpu.matmul %157, %159, %cst_60 {dimension_numbers = #tpu.dot_dimension_numbers<[1], [1], [0], [0], [0, 0, 1, 0], [], []>} : vector<16x128xbf16>, vector<16x128xbf16>, vector<16x16xf32> -> vector<16x16xf32>
    %163 = arith.addf %162, %31 : vector<16x16xf32>
    %cst_61 = arith.constant dense<0xFF800000> : vector<16xf32>
    %164 = vector.multi_reduction <maximumf>, %163, %cst_61 [1] : vector<16x16xf32> to vector<16xf32>
    %165 = vector.shape_cast %164 : vector<16xf32> to vector<16x1xf32>
    %166 = vector.broadcast %165 : vector<16x1xf32> to vector<16x16xf32>
    %167 = arith.subf %163, %166 : vector<16x16xf32>
    %168 = math.exp %167 : vector<16x16xf32>
    %cst_62 = arith.constant dense<0.000000e+00> : vector<16xf32>
    %169 = vector.multi_reduction <add>, %168, %cst_62 [1] : vector<16x16xf32> to vector<16xf32>
    %170 = vector.shape_cast %169 : vector<16xf32> to vector<16x1xf32>
    %171 = tpu.reciprocal %170 {approx = true} : vector<16x1xf32> -> vector<16x1xf32>
    %172 = vector.broadcast %171 : vector<16x1xf32> to vector<16x16xf32>
    %173 = arith.mulf %168, %172 : vector<16x16xf32>
    %174 = arith.truncf %173 : vector<16x16xf32> to vector<16x16xbf16>
    %cst_63 = arith.constant dense<0.000000e+00> : vector<16x128xf32>
    %175 = tpu.matmul %174, %161, %cst_63 {dimension_numbers = #tpu.dot_dimension_numbers<[1], [0], [0], [1], [0, 0, 1, 1], [], []>} : vector<16x16xbf16>, vector<16x128xbf16>, vector<16x128xf32> -> vector<16x128xf32>
    %176 = arith.truncf %175 : vector<16x128xf32> to vector<16x128xbf16>
    %c1_64 = arith.constant 1 : index
    %c0_65 = arith.constant 0 : index
    %c0_66 = arith.constant 0 : index
    %177 = vector.load %arg7[%c1_64, %c0_65, %c0_66] : memref<2x128x128xbf16, #tpu.memory_space<vmem>>, vector<1x128x128xbf16>
    %178 = vector.shape_cast %177 : vector<1x128x128xbf16> to vector<128x128xbf16>
    %cst_67 = arith.constant dense<0.000000e+00> : vector<16x128xf32>
    %179 = tpu.matmul %176, %178, %cst_67 {dimension_numbers = #tpu.dot_dimension_numbers<[1], [0], [0], [1], [0, 0, 1, 1], [], []>} : vector<16x128xbf16>, vector<128x128xbf16>, vector<16x128xf32> -> vector<16x128xf32>
    %180 = vector.extract_strided_slice %148 {offsets = [0, 0], sizes = [1, 128], strides = [1, 1]} : vector<8x128xf32> to vector<1x128xf32>
    %181 = vector.broadcast %180 : vector<1x128xf32> to vector<16x128xf32>
    %182 = arith.addf %179, %181 : vector<16x128xf32>
    %183 = arith.addf %145, %182 : vector<16x128xf32>
    %184 = vector.extract_strided_slice %148 {offsets = [1, 0], sizes = [1, 128], strides = [1, 1]} : vector<8x128xf32> to vector<1x128xf32>
    %185 = vector.extract_strided_slice %148 {offsets = [2, 0], sizes = [1, 128], strides = [1, 1]} : vector<8x128xf32> to vector<1x128xf32>
    %cst_68 = arith.constant dense<0.000000e+00> : vector<16xf32>
    %186 = vector.multi_reduction <add>, %183, %cst_68 [1] : vector<16x128xf32> to vector<16xf32>
    %187 = vector.shape_cast %186 : vector<16xf32> to vector<16x1xf32>
    %cst_69 = arith.constant 3.125000e-02 : f32
    %188 = vector.broadcast %cst_69 : f32 to vector<16x1xf32>
    %189 = arith.mulf %187, %188 : vector<16x1xf32>
    %190 = vector.broadcast %189 : vector<16x1xf32> to vector<16x128xf32>
    %191 = arith.subf %183, %190 : vector<16x128xf32>
    %192 = vector.broadcast %4 : vector<1x128xf32> to vector<16x128xf32>
    %193 = arith.mulf %191, %192 : vector<16x128xf32>
    %194 = arith.mulf %193, %193 : vector<16x128xf32>
    %cst_70 = arith.constant dense<0.000000e+00> : vector<16xf32>
    %195 = vector.multi_reduction <add>, %194, %cst_70 [1] : vector<16x128xf32> to vector<16xf32>
    %196 = vector.shape_cast %195 : vector<16xf32> to vector<16x1xf32>
    %cst_71 = arith.constant 3.125000e-02 : f32
    %197 = vector.broadcast %cst_71 : f32 to vector<16x1xf32>
    %198 = arith.mulf %196, %197 : vector<16x1xf32>
    %cst_72 = arith.constant 9.99999996E-13 : f32
    %199 = vector.broadcast %cst_72 : f32 to vector<16x1xf32>
    %200 = arith.addf %198, %199 : vector<16x1xf32>
    %201 = math.rsqrt %200 : vector<16x1xf32>
    %202 = vector.broadcast %201 : vector<16x1xf32> to vector<16x128xf32>
    %203 = arith.mulf %193, %202 : vector<16x128xf32>
    %204 = vector.broadcast %184 : vector<1x128xf32> to vector<16x128xf32>
    %205 = arith.mulf %203, %204 : vector<16x128xf32>
    %206 = vector.broadcast %185 : vector<1x128xf32> to vector<16x128xf32>
    %207 = arith.addf %205, %206 : vector<16x128xf32>
    %208 = arith.truncf %207 : vector<16x128xf32> to vector<16x128xbf16>
    %c1_73 = arith.constant 1 : index
    %c0_74 = arith.constant 0 : index
    %c0_75 = arith.constant 0 : index
    %209 = vector.load %arg9[%c1_73, %c0_74, %c0_75] : memref<2x128x128xbf16, #tpu.memory_space<vmem>>, vector<1x128x128xbf16>
    %210 = vector.shape_cast %209 : vector<1x128x128xbf16> to vector<128x128xbf16>
    %cst_76 = arith.constant dense<0.000000e+00> : vector<16x128xf32>
    %211 = tpu.matmul %208, %210, %cst_76 {dimension_numbers = #tpu.dot_dimension_numbers<[1], [0], [0], [1], [0, 0, 1, 1], [], []>} : vector<16x128xbf16>, vector<128x128xbf16>, vector<16x128xf32> -> vector<16x128xf32>
    %212 = vector.extract_strided_slice %148 {offsets = [3, 0], sizes = [1, 128], strides = [1, 1]} : vector<8x128xf32> to vector<1x128xf32>
    %213 = vector.broadcast %212 : vector<1x128xf32> to vector<16x128xf32>
    %214 = arith.addf %211, %213 : vector<16x128xf32>
    %215 = arith.mulf %214, %214 : vector<16x128xf32>
    %216 = arith.mulf %214, %215 : vector<16x128xf32>
    %cst_77 = arith.constant 4.471500e-02 : f32
    %217 = vector.broadcast %cst_77 : f32 to vector<16x128xf32>
    %218 = arith.mulf %217, %216 : vector<16x128xf32>
    %219 = arith.addf %214, %218 : vector<16x128xf32>
    %cst_78 = arith.constant 0.797884583 : f32
    %220 = vector.broadcast %cst_78 : f32 to vector<16x128xf32>
    %221 = arith.mulf %220, %219 : vector<16x128xf32>
    %222 = math.tanh %221 : vector<16x128xf32>
    %cst_79 = arith.constant 1.000000e+00 : f32
    %223 = vector.broadcast %cst_79 : f32 to vector<16x128xf32>
    %224 = arith.addf %223, %222 : vector<16x128xf32>
    %cst_80 = arith.constant 5.000000e-01 : f32
    %225 = vector.broadcast %cst_80 : f32 to vector<16x128xf32>
    %226 = arith.mulf %225, %224 : vector<16x128xf32>
    %227 = arith.mulf %214, %226 : vector<16x128xf32>
    %228 = arith.truncf %227 : vector<16x128xf32> to vector<16x128xbf16>
    %c1_81 = arith.constant 1 : index
    %c0_82 = arith.constant 0 : index
    %c0_83 = arith.constant 0 : index
    %229 = vector.load %arg10[%c1_81, %c0_82, %c0_83] : memref<2x128x128xbf16, #tpu.memory_space<vmem>>, vector<1x128x128xbf16>
    %230 = vector.shape_cast %229 : vector<1x128x128xbf16> to vector<128x128xbf16>
    %cst_84 = arith.constant dense<0.000000e+00> : vector<16x128xf32>
    %231 = tpu.matmul %228, %230, %cst_84 {dimension_numbers = #tpu.dot_dimension_numbers<[1], [0], [0], [1], [0, 0, 1, 1], [], []>} : vector<16x128xbf16>, vector<128x128xbf16>, vector<16x128xf32> -> vector<16x128xf32>
    %232 = vector.extract_strided_slice %148 {offsets = [4, 0], sizes = [1, 128], strides = [1, 1]} : vector<8x128xf32> to vector<1x128xf32>
    %233 = vector.broadcast %232 : vector<1x128xf32> to vector<16x128xf32>
    %234 = arith.addf %231, %233 : vector<16x128xf32>
    %235 = arith.addf %207, %234 : vector<16x128xf32>
    %236 = vector.extract_strided_slice %148 {offsets = [5, 0], sizes = [1, 128], strides = [1, 1]} : vector<8x128xf32> to vector<1x128xf32>
    %237 = vector.extract_strided_slice %148 {offsets = [6, 0], sizes = [1, 128], strides = [1, 1]} : vector<8x128xf32> to vector<1x128xf32>
    %cst_85 = arith.constant dense<0.000000e+00> : vector<16xf32>
    %238 = vector.multi_reduction <add>, %235, %cst_85 [1] : vector<16x128xf32> to vector<16xf32>
    %239 = vector.shape_cast %238 : vector<16xf32> to vector<16x1xf32>
    %cst_86 = arith.constant 3.125000e-02 : f32
    %240 = vector.broadcast %cst_86 : f32 to vector<16x1xf32>
    %241 = arith.mulf %239, %240 : vector<16x1xf32>
    %242 = vector.broadcast %241 : vector<16x1xf32> to vector<16x128xf32>
    %243 = arith.subf %235, %242 : vector<16x128xf32>
    %244 = vector.broadcast %4 : vector<1x128xf32> to vector<16x128xf32>
    %245 = arith.mulf %243, %244 : vector<16x128xf32>
    %246 = arith.mulf %245, %245 : vector<16x128xf32>
    %cst_87 = arith.constant dense<0.000000e+00> : vector<16xf32>
    %247 = vector.multi_reduction <add>, %246, %cst_87 [1] : vector<16x128xf32> to vector<16xf32>
    %248 = vector.shape_cast %247 : vector<16xf32> to vector<16x1xf32>
    %cst_88 = arith.constant 3.125000e-02 : f32
    %249 = vector.broadcast %cst_88 : f32 to vector<16x1xf32>
    %250 = arith.mulf %248, %249 : vector<16x1xf32>
    %cst_89 = arith.constant 9.99999996E-13 : f32
    %251 = vector.broadcast %cst_89 : f32 to vector<16x1xf32>
    %252 = arith.addf %250, %251 : vector<16x1xf32>
    %253 = math.rsqrt %252 : vector<16x1xf32>
    %254 = vector.broadcast %253 : vector<16x1xf32> to vector<16x128xf32>
    %255 = arith.mulf %245, %254 : vector<16x128xf32>
    %256 = vector.broadcast %236 : vector<1x128xf32> to vector<16x128xf32>
    %257 = arith.mulf %255, %256 : vector<16x128xf32>
    %258 = vector.broadcast %237 : vector<1x128xf32> to vector<16x128xf32>
    %259 = arith.addf %257, %258 : vector<16x128xf32>
    %c0_90 = arith.constant 0 : index
    %c0_91 = arith.constant 0 : index
    %260 = vector.load %arg13[%c0_90, %c0_91] : memref<16x128xf32, #tpu.memory_space<vmem>>, vector<16x128xf32>
    tpu.vector_store %arg13[%c0_90, %c0_91], %259 {strides = array<i32>} : memref<16x128xf32, #tpu.memory_space<vmem>>, vector<16x128xf32>,
    %c0_92 = arith.constant 0 : index
    %c0_93 = arith.constant 0 : index
    %261 = vector.load %arg3[%c0_92, %c0_93] : memref<16x1xf32, #tpu.memory_space<vmem>>, vector<16x1xf32>
    %262 = vector.broadcast %261 : vector<16x1xf32> to vector<16x128xf32>
    %263 = arith.mulf %259, %262 : vector<16x128xf32>
    %264 = arith.truncf %263 : vector<16x128xf32> to vector<16x128xbf16>
    %c0_94 = arith.constant 0 : index
    %c0_95 = arith.constant 0 : index
    %265 = vector.load %arg11[%c0_94, %c0_95] : memref<128x128xbf16, #tpu.memory_space<vmem>>, vector<128x128xbf16>
    %cst_96 = arith.constant dense<0.000000e+00> : vector<16x128xf32>
    %266 = tpu.matmul %264, %265, %cst_96 {dimension_numbers = #tpu.dot_dimension_numbers<[1], [0], [0], [1], [0, 0, 1, 1], [], []>} : vector<16x128xbf16>, vector<128x128xbf16>, vector<16x128xf32> -> vector<16x128xf32>
    %c0_97 = arith.constant 0 : index
    %c0_98 = arith.constant 0 : index
    %267 = vector.load %arg12[%c0_97, %c0_98] : memref<1x128xf32, #tpu.memory_space<vmem>>, vector<1x128xf32>
    %268 = vector.broadcast %267 : vector<1x128xf32> to vector<16x128xf32>
    %269 = arith.addf %266, %268 : vector<16x128xf32>
    %c0_99 = arith.constant 0 : index
    %c0_100 = arith.constant 0 : index
    %270 = vector.load %arg14[%c0_99, %c0_100] : memref<16x128xf32, #tpu.memory_space<vmem>>, vector<16x128xf32>
    tpu.vector_store %arg14[%c0_99, %c0_100], %269 {strides = array<i32>} : memref<16x128xf32, #tpu.memory_space<vmem>>, vector<16x128xf32>,
    return
  }
  func.func @transform_0(%arg0: i32) -> (i32, i32) {
    %c0_i32 = arith.constant 0 : i32
    %c0_i32_0 = arith.constant 0 : i32
    %c0_i32_1 = arith.constant 0 : i32
    return %c0_i32, %c0_i32_0 : i32, i32
  }
  func.func @transform_1(%arg0: i32) -> (i32, i32) {
    %c0_i32 = arith.constant 0 : i32
    %c0_i32_0 = arith.constant 0 : i32
    %c0_i32_1 = arith.constant 0 : i32
    return %c0_i32, %c0_i32_0 : i32, i32
  }
  func.func @transform_2(%arg0: i32) -> (i32, i32) {
    %c0_i32 = arith.constant 0 : i32
    %c0_i32_0 = arith.constant 0 : i32
    %c0_i32_1 = arith.constant 0 : i32
    return %c0_i32, %c0_i32_0 : i32, i32
  }
  func.func @transform_3(%arg0: i32) -> (i32, i32) {
    %c0_i32 = arith.constant 0 : i32
    %c0_i32_0 = arith.constant 0 : i32
    %c0_i32_1 = arith.constant 0 : i32
    return %c0_i32, %c0_i32_0 : i32, i32
  }
  func.func @transform_4(%arg0: i32) -> (i32, i32, i32) {
    %c0_i32 = arith.constant 0 : i32
    %c0_i32_0 = arith.constant 0 : i32
    %c0_i32_1 = arith.constant 0 : i32
    %c0_i32_2 = arith.constant 0 : i32
    return %c0_i32, %c0_i32_0, %c0_i32_1 : i32, i32, i32
  }
  func.func @transform_5(%arg0: i32) -> (i32, i32, i32) {
    %c0_i32 = arith.constant 0 : i32
    %c0_i32_0 = arith.constant 0 : i32
    %c0_i32_1 = arith.constant 0 : i32
    %c0_i32_2 = arith.constant 0 : i32
    return %c0_i32, %c0_i32_0, %c0_i32_1 : i32, i32, i32
  }
  func.func @transform_6(%arg0: i32) -> (i32, i32, i32) {
    %c0_i32 = arith.constant 0 : i32
    %c0_i32_0 = arith.constant 0 : i32
    %c0_i32_1 = arith.constant 0 : i32
    %c0_i32_2 = arith.constant 0 : i32
    return %c0_i32, %c0_i32_0, %c0_i32_1 : i32, i32, i32
  }
  func.func @transform_7(%arg0: i32) -> (i32, i32, i32) {
    %c0_i32 = arith.constant 0 : i32
    %c0_i32_0 = arith.constant 0 : i32
    %c0_i32_1 = arith.constant 0 : i32
    %c0_i32_2 = arith.constant 0 : i32
    return %c0_i32, %c0_i32_0, %c0_i32_1 : i32, i32, i32
  }
  func.func @transform_8(%arg0: i32) -> (i32, i32, i32) {
    %c0_i32 = arith.constant 0 : i32
    %c0_i32_0 = arith.constant 0 : i32
    %c0_i32_1 = arith.constant 0 : i32
    %c0_i32_2 = arith.constant 0 : i32
    return %c0_i32, %c0_i32_0, %c0_i32_1 : i32, i32, i32
  }
  func.func @transform_9(%arg0: i32) -> (i32, i32, i32) {
    %c0_i32 = arith.constant 0 : i32
    %c0_i32_0 = arith.constant 0 : i32
    %c0_i32_1 = arith.constant 0 : i32
    %c0_i32_2 = arith.constant 0 : i32
    return %c0_i32, %c0_i32_0, %c0_i32_1 : i32, i32, i32
  }
  func.func @transform_10(%arg0: i32) -> (i32, i32) {
    %c0_i32 = arith.constant 0 : i32
    %c0_i32_0 = arith.constant 0 : i32
    %c0_i32_1 = arith.constant 0 : i32
    return %c0_i32, %c0_i32_0 : i32, i32
  }
  func.func @transform_11(%arg0: i32) -> (i32, i32) {
    %c0_i32 = arith.constant 0 : i32
    %c0_i32_0 = arith.constant 0 : i32
    %c0_i32_1 = arith.constant 0 : i32
    return %c0_i32, %c0_i32_0 : i32, i32
  }
  func.func @transform_12(%arg0: i32) -> (i32, i32) {
    %c0_i32 = arith.constant 0 : i32
    %c0_i32_0 = arith.constant 0 : i32
    %c0_i32_1 = arith.constant 0 : i32
    return %c0_i32, %c0_i32_0 : i32, i32
  }
  func.func @transform_13(%arg0: i32) -> (i32, i32) {
    %c0_i32 = arith.constant 0 : i32
    %c0_i32_0 = arith.constant 0 : i32
    %c0_i32_1 = arith.constant 0 : i32
    return %c0_i32, %c0_i32_0 : i32, i32
  }
}

</mosaic_0001>

<bundles_post_ra>
// kernel: language_model_forward.1
= control target key start
LH: loop header
LB: loop body
LE: loop exit
PB: predicated region body
PF: predicated region fallthrough
CT: control target
= control target key end

     0   :  { %19 = vsyncpa [#allocation3], 0  ;;  %s2513_s25 = smov [#allocation2]   ;;  %s3158_s0 = inlined_call_operand.vmem [shape: f32[16,128], index: 0, kind: input, shape index: {}]   ;;  %s3159_s1 = inlined_call_operand.vmem [shape: f32[16,128], index: 1, kind: input, shape index: {}]   ;;  %s3160_s2 = inlined_call_operand.vmem [shape: f32[16,1], index: 2, kind: input, shape index: {}]   ;;  %s3161_s3 = inlined_call_operand.vmem [shape: f32[2,128], index: 3, kind: input, shape index: {}]   ;;  %s3162_s4 = inlined_call_operand.vmem [shape: bf16[2,128,384], index: 4, kind: input, shape index: {}]   ;;  %s3163_s5 = inlined_call_operand.vmem [shape: f32[2,1,384], index: 5, kind: input, shape index: {}]   ;;  %s3164_s6 = inlined_call_operand.vmem [shape: bf16[2,128,128], index: 6, kind: input, shape index: {}]   ;;  %s3165_s7 = inlined_call_operand.vmem [shape: f32[2,8,128], index: 7, kind: input, shape index: {}]   ;;  %s3166_s8 = inlined_call_operand.vmem [shape: bf16[2,128,128], index: 8, kind: input, shape index: {}]   ;;  %s3167_s9 = inlined_call_operand.hbm [shape: bf16[2,128,128], index: 9, kind: input, shape index: {}]   ;;  %s3168_s10 = inlined_call_operand.vmem [shape: bf16[128,128], index: 10, kind: input, shape index: {}]   ;;  %s3169_s11 = inlined_call_operand.vmem [shape: f32[1,128], index: 11, kind: input, shape index: {}]   ;;  %s3170_s12 = inlined_call_operand.vmem [shape: f32[16,128], index: 12, kind: output, shape index: {0}]   ;;  %s3171_s13 = inlined_call_operand.vmem [shape: f32[16,128], index: 13, kind: output, shape index: {1}]  }
   0x1   :  { %s43_s26 = sshll.u32 %s2513_s25, 4  ;;  %s2489_s29 = scalar_lea.hbm %s3167_s9, 2048  ;;  %s44_s26 = int_to_ptr.vmem [resolvable:$true] %s43_s26 }
   0x2   :  { %p2490_p0 = scmp.ne.s32.totalorder %s3167_s9, %s2489_s29  ;;  %p2493_p1 = scmp.lt.u32.totalorder %s2489_s29, %s3167_s9 }
   0x4   :  { %p2495_p2 = pnand %p2493_p1, %p2490_p0 }
   0x6   :  { %2498 = shalt.err (!%p2495_p2)
}
   0x7   :  { %s2499_s17 = scalar_lea.vmem %s44_s26, 2048  ;;  %p2504_p4 = scmp.lt.s32.totalorder %s44_s26, %s44_s26 }
   0x8   :  { %p2500_p3 = scmp.ne.s32.totalorder %s44_s26, %s2499_s17  ;;  %p2505_p5 = scmp.lt.s32.totalorder %s2499_s17, %s2499_s17 }
   0xa   :  { %p2506_p6 = por %p2505_p5, %p2504_p4 }
   0xc   :  { %p2507_p7 = pnand %p2506_p6, %p2500_p3 }
   0xe   :  { %2510 = shalt.err (!%p2507_p7)
}
   0xf   :  { %s2514_s18 = smov 64   ;;  %s2515_s19 = smov 4  }
  0x10   :  { %49 = dma.hbm_to_vmem [thread:$0]  %s3167_s9, 2048, %s44_s26, [#allocation3], %s2514_s18, %s2514_s18, %s2515_s19  }
  0x11   :  { %2511 = dma.done.wait [#allocation3], 2048  }
  0x12   :  { %2512 = vsyncadd [#allocation3], 4294965248  ;;  %v63_v0 = vld [vmem:[%s3158_s0] sm:$0xff]  ;;  %v64_v1 = vld [vmem:[%s3158_s0 + $0x8] sm:$0xff]  ;;  %v2516_v2 = vmov 0.0   ;;  %v58_v7 = vlaneseq  ;;  %v2517_v35 = vmov 0  }
  0x13   :  { %67 = vadd.xlane.f32.xlu0 %v63_v0  ;;  %2113 = vmatprep.subr.bf16.mxu1 %v2516_v2  ;;  %v2325_v3 = vld [vmem:[%s3162_s4 + $0x4] ss:$12 sps:$4 sm:$0xff]   ;;  %v2327_v4 = vld [vmem:[%s3162_s4] ss:$12 sps:$4 sm:$0xff]   ;;  %v2328_v5 = vld [vmem:[%s3162_s4 + $0x8] ss:$12 sps:$4 sm:$0xff]  }
  0x14   :  { %v2329_v6 = vld [vmem:[%s3162_s4 + $0x1c] ss:$12 sps:$4 sm:$0xff]   ;;  %284 = vmatprep.subr.bf16.mxu0 %v2325_v3  ;;  %2114 = vmatpush3.bf16.msra.mxu1 %v2328_v5  ;;  %v59_v8 = vand.u32 127, %v58_v7  ;;  %v2331_v20 = vld [vmem:[%s3162_s4 + $0x18] ss:$12 sps:$4 sm:$0xff]   ;;  %vm2518_vm1 = vmmov 0  }
  0x15   :  { %285 = vmatpush1.bf16.msra.mxu0 %v2327_v4  ;;  %2115 = vmatprep.subr.bf16.mxu1 %v2516_v2  ;;  %v2332_v21 = vld [vmem:[%s3162_s4 + $0x20] ss:$12 sps:$4 sm:$0xff]   ;;  %v2335_v23 = vld [vmem:[%s3162_s4 + $0x30] ss:$12 sps:$4 sm:$0xff]   ;;  %v2336_v24 = vld [vmem:[%s3162_s4 + $0x38] ss:$12 sps:$4 sm:$0xff]  }
  0x16   :  { %286 = vmatprep.subr.bf16.mxu0 %v2329_v6  ;;  %vm60_vm0 = vcmp.lt.s32.totalorder %v59_v8, 32  ;;  %v2333_v22 = vld [vmem:[%s3162_s4 + $0x34] ss:$12 sps:$4 sm:$0xff]   ;;  %v2337_v25 = vld [vmem:[%s3162_s4 + $0x4c] ss:$12 sps:$4 sm:$0xff]   ;;  %316 = vmatprep.mubr.bf16.mxu0 %v2517_v35  ;;  %v2727_v58 = vshrl.u32 %v58_v7, 7 }
  0x17   :  { %69 = vadd.xlane.f32.xlu0 %v64_v1  ;;  %v2623_v11 = vsel %vm60_vm0, 1.0, %v2516_v2  ;;  %v2339_v26 = vld [vmem:[%s3162_s4 + $0x48] ss:$12 sps:$4 sm:$0xff]   ;;  %v2340_v27 = vld [vmem:[%s3162_s4 + $0x50] ss:$12 sps:$4 sm:$0xff]   ;;  %2129 = vmatprep.mubr.msk.bf16.mxu1 %vm2518_vm1, %v2516_v2  ;;  %vm412_vm2 = vcmask 130048  }
  0x18   :  { %2116 = vmatpush3.bf16.msra.mxu1 %v2332_v21  ;;  %v2341_v28 = vld [vmem:[%s3162_s4 + $0x64] ss:$12 sps:$4 sm:$0xff]   ;;  %v2343_v29 = vld [vmem:[%s3162_s4 + $0x60] ss:$12 sps:$4 sm:$0xff]   ;;  %v2344_v30 = vld [vmem:[%s3162_s4 + $0x68] ss:$12 sps:$4 sm:$0xff]   ;;  %2323 = vset.pattern.permute.xlu0 %v2517_v35 }
  0x19   :  { %287 = vmatpush1.bf16.msra.mxu0 %v2331_v20  ;;  %2117 = vmatprep.subr.bf16.mxu1 %v2516_v2  ;;  %v2345_v31 = vld [vmem:[%s3162_s4 + $0x7c] ss:$12 sps:$4 sm:$0xff]   ;;  %v2347_v32 = vld [vmem:[%s3162_s4 + $0x78] ss:$12 sps:$4 sm:$0xff]   ;;  %v2348_v33 = vld [vmem:[%s3162_s4 + $0x80] ss:$12 sps:$4 sm:$0xff]  }
  0x1a   :  { %288 = vmatprep.subr.bf16.mxu0 %v2333_v22  ;;  %v2349_v34 = vld [vmem:[%s3162_s4 + $0x94] ss:$12 sps:$4 sm:$0xff]   ;;  %2324 = vset.pattern.permute.xlu1 %v2517_v35  ;;  %v2351_v36 = vld [vmem:[%s3162_s4 + $0x90] ss:$12 sps:$4 sm:$0xff]   ;;  %v2352_v37 = vld [vmem:[%s3162_s4 + $0x98] ss:$12 sps:$4 sm:$0xff]  }
  0x1b   :  { %v2353_v38 = vld [vmem:[%s3162_s4 + $0xac] ss:$12 sps:$4 sm:$0xff]   ;;  %v2355_v39 = vld [vmem:[%s3162_s4 + $0xa8] ss:$12 sps:$4 sm:$0xff]   ;;  %v2356_v40 = vld [vmem:[%s3162_s4 + $0xb0] ss:$12 sps:$4 sm:$0xff]  }
  0x1c   :  { %2118 = vmatpush3.bf16.msra.mxu1 %v2336_v24  ;;  %v1849_v49 = vld [vmem:[%s3161_s3] ss:$0 sm:$0xff]  ;;  %v1850_v53 = vld [vmem:[%s3161_s3 + $0x1] ss:$0 sm:$0xff]  ;;  %v2730_v59 = vsub.s32 0, %v2727_v58  ;;  %v2733_v60 = vsub.s32 2, %v2727_v58 }
  0x1d   :  { %289 = vmatpush1.bf16.msra.mxu0 %v2335_v23  ;;  %2119 = vmatprep.subr.bf16.mxu1 %v2516_v2  ;;  %v139_v61 = vld [vmem:[%s3163_s5] sm:$0x7]  ;;  %v2739_v62 = vsub.s32 1, %v2727_v58  ;;  %v2756_v23 = vld [vmem:[%s3159_s1 + $0x8] sm:$0xff] }
  0x1e   :  { %290 = vmatprep.subr.bf16.mxu0 %v2337_v25  ;;  %v144_v63 = vrot.slane %v139_v61, %v2730_v59  ;;  %v2751_v21 = vld [vmem:[%s3159_s1] sm:$0xff] }
  0x1f   :  { %v148_v4 = vrot.slane %v139_v61, %v2739_v62 }
  0x20   :  { %2120 = vmatpush3.bf16.msra.mxu1 %v2340_v27 }
  0x21   :  { %291 = vmatpush1.bf16.msra.mxu0 %v2339_v26  ;;  %2121 = vmatprep.subr.bf16.mxu1 %v2516_v2 }
  0x22   :  { %292 = vmatprep.subr.bf16.mxu0 %v2341_v28 }
  0x24   :  { %2122 = vmatpush3.bf16.msra.mxu1 %v2344_v30 }
  0x25   :  { %293 = vmatpush1.bf16.msra.mxu0 %v2343_v29  ;;  %2123 = vmatprep.subr.bf16.mxu1 %v2516_v2 }
  0x26   :  { %294 = vmatprep.subr.bf16.mxu0 %v2345_v31 }
  0x28   :  { %2124 = vmatpush3.bf16.msra.mxu1 %v2348_v33 }
  0x29   :  { %295 = vmatpush1.bf16.msra.mxu0 %v2347_v32  ;;  %2125 = vmatprep.subr.bf16.mxu1 %v2516_v2 }
  0x2a   :  { %296 = vmatprep.subr.bf16.mxu0 %v2349_v34 }
  0x2c   :  { %2126 = vmatpush3.bf16.msra.mxu1 %v2352_v37 }
  0x2d   :  { %297 = vmatpush1.bf16.msra.mxu0 %v2351_v36  ;;  %2127 = vmatprep.subr.bf16.mxu1 %v2516_v2 }
  0x2e   :  { %298 = vmatprep.subr.bf16.mxu0 %v2353_v38 }
  0x30   :  { %2128 = vmatpush3.bf16.msra.mxu1 %v2356_v40 }
  0x31   :  { %299 = vmatpush1.bf16.msra.mxu0 %v2355_v39  ;;  %2133 = vmatprep.subr.bf16.mxu1 %v2516_v2 }
  0x32   :  { %2145 = vmatprep.subr.bf16.mxu0 %v2516_v2 }
  0xa0   :  { %v68_v9 = vpop.xlane.xlu0 %67 }
  0xa1   :  { %v71_v10 = vmul.f32 0.03125, %v68_v9 }
  0xa3   :  { %v73_v12 = vsub.f32 %v63_v0, %v71_v10  ;;  %v152_v0 = vrot.slane %v139_v61, %v2733_v60  ;;  %v2364_v61 = vld [vmem:[%s3164_s6 + $0x38] sm:$0xff]  }
  0xa4   :  { %v70_v13 = vpop.xlane.xlu0 %69 }
  0xa5   :  { %v72_v14 = vmul.f32 0.03125, %v70_v13  ;;  %v2626_v15 = vmul.f32 %v2623_v11, %v73_v12 }
  0xa7   :  { %v74_v16 = vsub.f32 %v64_v1, %v72_v14  ;;  %v77_v17 = vmul.f32 %v2626_v15, %v2626_v15 }
  0xa9   :  { %79 = vadd.xlane.f32.xlu1 %v77_v17  ;;  %v2631_v18 = vmul.f32 %v2623_v11, %v74_v16 }
  0xab   :  { %v78_v19 = vmul.f32 %v2631_v18, %v2631_v18 }
  0xad   :  { %81 = vadd.xlane.f32.xlu1 %v78_v19 }
 0x136   :  { %v80_v41 = vpop.xlane.xlu1 %79 }
 0x137   :  { %v83_v42 = vmul.f32 0.03125, %v80_v41 }
 0x139   :  { %v85_v43 = vadd.f32 1e-12, %v83_v42  ;;  %v2357_v42 = vld [vmem:[%s3164_s6] sm:$0xff]  }
 0x13a   :  { %v82_v44 = vpop.xlane.xlu1 %81 }
 0x13b   :  { %2445 = vrsqrt.f32 %v85_v43  ;;  %v84_v45 = vmul.f32 0.03125, %v82_v44  ;;  %v2358_v43 = vld [vmem:[%s3164_s6 + $0x8] sm:$0xff]   ;;  %v2359_v44 = vld [vmem:[%s3164_s6 + $0x10] sm:$0xff]  }
 0x13d   :  { %v86_v46 = vadd.f32 1e-12, %v84_v45  ;;  %v2360_v45 = vld [vmem:[%s3164_s6 + $0x18] sm:$0xff]  }
 0x13f   :  { %2447 = vrsqrt.f32 %v86_v46  ;;  %v2361_v46 = vld [vmem:[%s3164_s6 + $0x20] sm:$0xff]  }
 0x145   :  { %v2446_v47 = vpop.eup %2445 }
 0x146   :  { %v89_v48 = vmul.f32 %v2446_v47, %v2626_v15  ;;  %v2362_v47 = vld [vmem:[%s3164_s6 + $0x28] sm:$0xff]  }
 0x148   :  { %v95_v52 = vmul.f32 %v1849_v49, %v89_v48  ;;  %v2363_v48 = vld [vmem:[%s3164_s6 + $0x30] sm:$0xff]  }
 0x149   :  { %v2448_v50 = vpop.eup %2447 }
 0x14a   :  { %v90_v51 = vmul.f32 %v2448_v50, %v2631_v18  ;;  %v2716_v55 = vadd.f32 %v1850_v53, %v95_v52 }
 0x14c   :  { %v96_v54 = vmul.f32 %v1849_v49, %v90_v51 }
 0x14e   :  { %v2718_v56 = vadd.f32 %v1850_v53, %v96_v54 }
 0x150   :  { %v105_v57 = vpack.c.bf16 %v2718_v56, %v2716_v55 }
 0x152   :  { %317 = vmatmul.mubr.bf16.vlgmr.msra.gmra.mrb[0].mxu0 %v105_v57  ;;  %2130 = vmatmul.mubr.bf16.vlgmr.msra.gmra.mrb[0].mxu1 %v105_v57 }
 0x153   :  { %2135 = vmatprep.mubr.msk.bf16.mxu1 %vm2518_vm1, %v2516_v2  ;;  %2161 = vmatprep.mubr.msk.bf16.mxu0 %vm2518_vm1, %v2516_v2 }
 0x154   :  { %2146 = vmatpush3.bf16.msra.mxu0 %v2357_v42 }
 0x155   :  { %2147 = vmatprep.subr.bf16.mxu0 %v2516_v2 }
 0x158   :  { %2148 = vmatpush3.bf16.msra.mxu0 %v2358_v43 }
 0x159   :  { %2149 = vmatprep.subr.bf16.mxu0 %v2516_v2 }
 0x15c   :  { %2150 = vmatpush3.bf16.msra.mxu0 %v2359_v44 }
 0x15d   :  { %2151 = vmatprep.subr.bf16.mxu0 %v2516_v2 }
 0x160   :  { %2152 = vmatpush3.bf16.msra.mxu0 %v2360_v45 }
 0x161   :  { %2153 = vmatprep.subr.bf16.mxu0 %v2516_v2 }
 0x164   :  { %2154 = vmatpush3.bf16.msra.mxu0 %v2361_v46 }
 0x165   :  { %2155 = vmatprep.subr.bf16.mxu0 %v2516_v2 }
 0x168   :  { %2156 = vmatpush3.bf16.msra.mxu0 %v2362_v47 }
 0x169   :  { %2157 = vmatprep.subr.bf16.mxu0 %v2516_v2 }
 0x16c   :  { %2158 = vmatpush3.bf16.msra.mxu0 %v2363_v48 }
 0x16d   :  { %2159 = vmatprep.subr.bf16.mxu0 %v2516_v2 }
 0x170   :  { %2160 = vmatpush3.bf16.msra.mxu0 %v2364_v61  ;;  %v2377_v61 = vld [vmem:[#allocation2 + $0x20] sm:$0xff]  }
 0x171   :  { %2185 = vmatprep.subr.bf16.mxu0 %v2516_v2 }
 0x225   :  { %v318_v1 = vpop.f32.mrb[0].mxu0  ;;  %v361_v3 = vpop.f32.mrb[0].mxu1 }
 0x226   :  { %v320_v5 = vpop.f32.mrb[1].mxu0  ;;  %v2131_v6 = vpop.f32.mrb[1].mxu1  ;;  %v319_v9 = vadd.f32 %v318_v1, %v144_v63  ;;  %v362_v10 = vadd.f32 %v361_v3, %v152_v0 }
 0x227   :  { %v322_v7 = vpop.f32.mrb[2].mxu0  ;;  %v364_v8 = vpop.f32.mrb[2].mxu1  ;;  %v321_v16 = vadd.f32 %v320_v5, %v148_v4  ;;  %v2804_v5 = vld [vmem:[%s3165_s7] sm:$0xff] }
 0x228   :  { %v323_v12 = vadd.f32 %v322_v7, %v144_v63  ;;  %v365_v13 = vadd.f32 %v364_v8, %v152_v0  ;;  %v324_v14 = vpop.f32.mrb[3].mxu0  ;;  %v2132_v15 = vpop.f32.mrb[3].mxu1  ;;  %v500_v6 = vrot.slane %v2804_v5, %v2730_v59  ;;  %v625_v47 = vrot.slane %v2804_v5, %v2733_v60 }
 0x229   :  { %v325_v17 = vadd.f32 %v324_v14, %v148_v4 }
 0x22a   :  { %v368_v18 = vpack.c.bf16 %v323_v12, %v319_v9  ;;  %v370_v19 = vpack.c.bf16 %v365_v13, %v362_v10 }
 0x22b   :  { %v369_v20 = vpack.c.bf16 %v325_v17, %v321_v16  ;;  %v2365_v16 = vld [vmem:[%s3166_s8] sm:$0xff]   ;;  %v2366_v17 = vld [vmem:[%s3166_s8 + $0x8] sm:$0xff]  }
 0x22d   :  { %2134 = vmatpush3.bf16.xpose.msra.mxu1 %v369_v20 }
 0x22e   :  { %2139 = vmatprep.subr.bf16.mxu1 %v2516_v2 }
 0x234   :  { %2136 = vmatmul.mubr.bf16.vlgmr.msra.gmra.mrb[4].mxu1 %v368_v18 }
 0x235   :  { %2140 = vmatpush3.bf16.msra.mxu1 %v370_v19  ;;  %2141 = vmatprep.mubr.msk.bf16.mxu1 %vm2518_vm1, %v2516_v2 }
 0x236   :  { %2165 = vmatprep.subr.bf16.mxu1 %v2516_v2 }
 0x307   :  { %v405_v22 = vpop.f32.mrb[4].mxu1 }
 0x308   :  { %v406_v24 = vadd.f32 %v405_v22, %v2751_v21  ;;  %v2137_v25 = vpop.f32.mrb[5].mxu1 }
 0x309   :  { %v408_v26 = vpop.f32.mrb[6].mxu1 }
 0x30a   :  { %v409_v27 = vadd.f32 %v408_v26, %v2756_v23  ;;  %v2138_v28 = vpop.f32.mrb[7].mxu1  ;;  %v413_v29 = vsel %vm412_vm2, %v406_v24, -inf }
 0x30b   :  { %414 = vmax.xlane.f32.xlu0 %v413_v29  ;;  %v2367_v28 = vld [vmem:[%s3166_s8 + $0x10] sm:$0xff]   ;;  %v2368_v29 = vld [vmem:[%s3166_s8 + $0x18] sm:$0xff]  }
 0x30c   :  { %v416_v30 = vsel %vm412_vm2, %v409_v27, -inf }
 0x30d   :  { %417 = vmax.xlane.f32.xlu1 %v416_v30  ;;  %v2369_v30 = vld [vmem:[%s3166_s8 + $0x20] sm:$0xff]  }
 0x398   :  { %v415_v31 = vpop.xlane.xlu0 %414 }
 0x399   :  { %v419_v32 = vsub.f32 %v406_v24, %v415_v31  ;;  %v2370_v31 = vld [vmem:[%s3166_s8 + $0x28] sm:$0xff]  }
 0x39a   :  { %v418_v33 = vpop.xlane.xlu1 %417 }
 0x39b   :  { %v421_v34 = vmul.f32 1.442695, %v419_v32  ;;  %v420_v36 = vsub.f32 %v409_v27, %v418_v33  ;;  %v2371_v32 = vld [vmem:[%s3166_s8 + $0x30] sm:$0xff]   ;;  %v2372_v33 = vld [vmem:[%s3166_s8 + $0x38] sm:$0xff]  }
 0x39d   :  { %2449 = vpow2.f32 %v421_v34  ;;  %v423_v37 = vmul.f32 1.442695, %v420_v36 }
 0x39f   :  { %2451 = vpow2.f32 %v423_v37 }
 0x3a7   :  { %v2450_v38 = vpop.eup %2449 }
 0x3a8   :  { %v425_v39 = vsel %vm412_vm2, %v2450_v38, 0.0 }
 0x3a9   :  { %v2452_v40 = vpop.eup %2451  ;;  %426 = vadd.xlane.f32.xlu0 %v425_v39 }
 0x3aa   :  { %v428_v41 = vsel %vm412_vm2, %v2452_v40, 0.0 }
 0x3ab   :  { %429 = vadd.xlane.f32.xlu1 %v428_v41  ;;  %v619_v41 = vrot.slane %v2804_v5, %v2739_v62 }
 0x436   :  { %v427_v49 = vpop.xlane.xlu0 %426 }
 0x437   :  { %2453 = vrcp.f32 %v427_v49 }
 0x438   :  { %v430_v50 = vpop.xlane.xlu1 %429 }
 0x439   :  { %2455 = vrcp.f32 %v430_v50 }
 0x441   :  { %v2454_v51 = vpop.eup %2453 }
 0x442   :  { %v433_v53 = vmul.f32 %v2454_v51, %v2450_v38 }
 0x443   :  { %v2456_v52 = vpop.eup %2455 }
 0x444   :  { %v434_v54 = vmul.f32 %v2456_v52, %v2452_v40  ;;  %v2373_v52 = vld [vmem:[#allocation2] sm:$0xff]  }
 0x446   :  { %v435_v57 = vpack.c.bf16 %v434_v54, %v433_v53  ;;  %v2374_v53 = vld [vmem:[#allocation2 + $0x8] sm:$0xff]   ;;  %v2375_v54 = vld [vmem:[#allocation2 + $0x10] sm:$0xff]  }
 0x448   :  { %2142 = vmatmul.mubr.msk.bf16.vlgmr.msra.gmra.mrb[8].mxu1 %vm412_vm2, %v435_v57  ;;  %v2376_v57 = vld [vmem:[#allocation2 + $0x18] sm:$0xff]  }
 0x449   :  { %2181 = vmatprep.mubr.msk.bf16.mxu1 %vm2518_vm1, %v2516_v2  ;;  %2166 = vmatpush3.bf16.msra.mxu1 %v2365_v16 }
 0x44a   :  { %2167 = vmatprep.subr.bf16.mxu1 %v2516_v2 }
 0x44d   :  { %2168 = vmatpush3.bf16.msra.mxu1 %v2366_v17 }
 0x44e   :  { %2169 = vmatprep.subr.bf16.mxu1 %v2516_v2 }
 0x451   :  { %2170 = vmatpush3.bf16.msra.mxu1 %v2367_v28 }
 0x452   :  { %2171 = vmatprep.subr.bf16.mxu1 %v2516_v2 }
 0x455   :  { %2172 = vmatpush3.bf16.msra.mxu1 %v2368_v29 }
 0x456   :  { %2173 = vmatprep.subr.bf16.mxu1 %v2516_v2 }
 0x459   :  { %2174 = vmatpush3.bf16.msra.mxu1 %v2369_v30 }
 0x45a   :  { %2175 = vmatprep.subr.bf16.mxu1 %v2516_v2 }
 0x45d   :  { %2176 = vmatpush3.bf16.msra.mxu1 %v2370_v31  ;;  %v775_v31 = vsub.s32 4, %v2727_v58 }
 0x45e   :  { %2177 = vmatprep.subr.bf16.mxu1 %v2516_v2 }
 0x461   :  { %2178 = vmatpush3.bf16.msra.mxu1 %v2371_v32  ;;  %v776_v32 = vrot.slane %v2804_v5, %v775_v31 }
 0x462   :  { %2179 = vmatprep.subr.bf16.mxu1 %v2516_v2 }
 0x465   :  { %2180 = vmatpush3.bf16.msra.mxu1 %v2372_v33 }
 0x51b   :  { %v473_v63 = vpop.f32.mrb[8].mxu1 }
 0x51c   :  { %v2143_v0 = vpop.f32.mrb[9].mxu1 }
 0x51d   :  { %v476_v1 = vpop.f32.mrb[10].mxu1  ;;  %v2380_v0 = vld [vmem:[#allocation2 + $0x38] sm:$0xff]  }
 0x51e   :  { %v480_v3 = vpack.c.bf16 %v476_v1, %v473_v63  ;;  %v2144_v4 = vpop.f32.mrb[11].mxu1  ;;  %v2379_v63 = vld [vmem:[#allocation2 + $0x30] sm:$0xff]   ;;  %v647_v1 = vsub.s32 3, %v2727_v58 }
 0x520   :  { %2162 = vmatmul.mubr.bf16.vlgmr.msra.gmra.mrb[4].mxu0 %v480_v3  ;;  %v648_v3 = vrot.slane %v2804_v5, %v647_v1 }
 0x521   :  { %2201 = vmatprep.mubr.msk.bf16.mxu0 %vm2518_vm1, %v2516_v2  ;;  %2186 = vmatpush3.bf16.msra.mxu0 %v2373_v52 }
 0x522   :  { %2187 = vmatprep.subr.bf16.mxu0 %v2516_v2 }
 0x525   :  { %2188 = vmatpush3.bf16.msra.mxu0 %v2374_v53 }
 0x526   :  { %2189 = vmatprep.subr.bf16.mxu0 %v2516_v2 }
 0x529   :  { %2190 = vmatpush3.bf16.msra.mxu0 %v2375_v54 }
 0x52a   :  { %2191 = vmatprep.subr.bf16.mxu0 %v2516_v2 }
 0x52d   :  { %2192 = vmatpush3.bf16.msra.mxu0 %v2376_v57 }
 0x52e   :  { %2193 = vmatprep.subr.bf16.mxu0 %v2516_v2 }
 0x531   :  { %2194 = vmatpush3.bf16.msra.mxu0 %v2377_v61 }
 0x532   :  { %2195 = vmatprep.subr.bf16.mxu0 %v2516_v2 }
 0x5f3   :  { %v583_v7 = vpop.f32.mrb[4].mxu0 }
 0x5f4   :  { %v584_v8 = vadd.f32 %v583_v7, %v500_v6  ;;  %v2163_v9 = vpop.f32.mrb[5].mxu0 }
 0x5f5   :  { %v586_v10 = vpop.f32.mrb[6].mxu0 }
 0x5f6   :  { %v587_v12 = vadd.f32 %v586_v10, %v500_v6  ;;  %v2164_v13 = vpop.f32.mrb[7].mxu0  ;;  %v590_v14 = vadd.f32 %v584_v8, %v2716_v55 }
 0x5f8   :  { %592 = vadd.xlane.f32.xlu0 %v590_v14  ;;  %v591_v15 = vadd.f32 %v587_v12, %v2718_v56 }
 0x5fa   :  { %594 = vadd.xlane.f32.xlu1 %v591_v15 }
 0x685   :  { %v593_v18 = vpop.xlane.xlu0 %592 }
 0x686   :  { %v596_v55 = vmul.f32 0.03125, %v593_v18 }
 0x687   :  { %v595_v19 = vpop.xlane.xlu1 %594 }
 0x688   :  { %v598_v20 = vsub.f32 %v590_v14, %v596_v55  ;;  %v597_v56 = vmul.f32 0.03125, %v595_v19 }
 0x68a   :  { %v599_v22 = vsub.f32 %v591_v15, %v597_v56  ;;  %v600_v24 = vmul.f32 %v2623_v11, %v598_v20 }
 0x68c   :  { %v602_v25 = vmul.f32 %v600_v24, %v600_v24  ;;  %v601_v26 = vmul.f32 %v2623_v11, %v599_v22 }
 0x68e   :  { %604 = vadd.xlane.f32.xlu0 %v602_v25  ;;  %v603_v27 = vmul.f32 %v601_v26, %v601_v26 }
 0x690   :  { %606 = vadd.xlane.f32.xlu1 %v603_v27 }
 0x71b   :  { %v605_v34 = vpop.xlane.xlu0 %604 }
 0x71c   :  { %v608_v36 = vmul.f32 0.03125, %v605_v34 }
 0x71d   :  { %v607_v37 = vpop.xlane.xlu1 %606 }
 0x71e   :  { %v610_v38 = vadd.f32 1e-12, %v608_v36  ;;  %v609_v39 = vmul.f32 0.03125, %v607_v37 }
 0x720   :  { %2457 = vrsqrt.f32 %v610_v38  ;;  %v611_v40 = vadd.f32 1e-12, %v609_v39 }
 0x722   :  { %2459 = vrsqrt.f32 %v611_v40 }
 0x72a   :  { %v2458_v42 = vpop.eup %2457 }
 0x72b   :  { %v614_v43 = vmul.f32 %v2458_v42, %v600_v24  ;;  %v2381_v42 = vld [vmem:[%s3162_s4 + $0xc0] ss:$12 sps:$4 sm:$0xff]  }
 0x72c   :  { %v2460_v44 = vpop.eup %2459 }
 0x72d   :  { %v615_v45 = vmul.f32 %v2460_v44, %v601_v26  ;;  %v620_v46 = vmul.f32 %v619_v41, %v614_v43  ;;  %v2383_v43 = vld [vmem:[%s3162_s4 + $0xc4] ss:$12 sps:$4 sm:$0xff]   ;;  %v2384_v44 = vld [vmem:[%s3162_s4 + $0xc8] ss:$12 sps:$4 sm:$0xff]  }
 0x72e   :  { %1086 = vmatprep.subr.bf16.mxu1 %v2383_v43 }
 0x72f   :  { %v621_v48 = vmul.f32 %v619_v41, %v615_v45  ;;  %v2847_v49 = vadd.f32 %v625_v47, %v620_v46  ;;  %v2387_v45 = vld [vmem:[%s3162_s4 + $0xdc] ss:$12 sps:$4 sm:$0xff]   ;;  %v2388_v46 = vld [vmem:[%s3162_s4 + $0xe0] ss:$12 sps:$4 sm:$0xff]  }
 0x731   :  { %v2849_v50 = vadd.f32 %v625_v47, %v621_v48  ;;  %v2385_v47 = vld [vmem:[%s3162_s4 + $0xd8] ss:$12 sps:$4 sm:$0xff]  }
 0x733   :  { %v628_v51 = vpack.c.bf16 %v2849_v50, %v2847_v49 }
 0x735   :  { %2182 = vmatmul.mubr.bf16.vlgmr.msra.gmra.mrb[12].mxu1 %v628_v51 }
 0x736   :  { %1118 = vmatprep.mubr.bf16.mxu1 %v2517_v35  ;;  %v2378_v35 = vld [vmem:[#allocation2 + $0x28] sm:$0xff]   ;;  %1087 = vmatpush1.bf16.msra.mxu1 %v2381_v42 }
 0x737   :  { %2196 = vmatpush3.bf16.msra.mxu0 %v2378_v35  ;;  %1088 = vmatprep.subr.bf16.mxu1 %v2387_v45 }
 0x738   :  { %2197 = vmatprep.subr.bf16.mxu0 %v2516_v2 }
 0x73a   :  { %1089 = vmatpush1.bf16.msra.mxu1 %v2385_v47 }
 0x73b   :  { %2198 = vmatpush3.bf16.msra.mxu0 %v2379_v63  ;;  %v2391_v63 = vld [vmem:[%s3162_s4 + $0xf4] ss:$12 sps:$4 sm:$0xff]  }
 0x73c   :  { %2199 = vmatprep.subr.bf16.mxu0 %v2516_v2  ;;  %1090 = vmatprep.subr.bf16.mxu1 %v2391_v63 }
 0x73f   :  { %2200 = vmatpush3.bf16.msra.mxu0 %v2380_v0  ;;  %v2389_v0 = vld [vmem:[%s3162_s4 + $0xf0] ss:$12 sps:$4 sm:$0xff]  }
 0x740   :  { %2205 = vmatprep.subr.bf16.mxu0 %v2516_v2  ;;  %1091 = vmatpush1.bf16.msra.mxu1 %v2389_v0 }
 0x808   :  { %v731_v4 = vpop.f32.mrb[12].mxu1 }
 0x809   :  { %v732_v6 = vadd.f32 %v731_v4, %v648_v3  ;;  %v2183_v7 = vpop.f32.mrb[13].mxu1  ;;  %v2395_v4 = vld [vmem:[%s3162_s4 + $0x10c] ss:$12 sps:$4 sm:$0xff]  }
 0x80a   :  { %v734_v8 = vpop.f32.mrb[14].mxu1  ;;  %v2396_v7 = vld [vmem:[%s3162_s4 + $0x110] ss:$12 sps:$4 sm:$0xff]   ;;  %1092 = vmatprep.subr.bf16.mxu1 %v2395_v4 }
 0x80b   :  { %v738_v9 = vmul.f32 %v732_v6, %v732_v6  ;;  %v735_v10 = vadd.f32 %v734_v8, %v648_v3  ;;  %v2184_v12 = vpop.f32.mrb[15].mxu1  ;;  %v2392_v3 = vld [vmem:[%s3162_s4 + $0xf8] ss:$12 sps:$4 sm:$0xff]  }
 0x80c   :  { %v2399_v8 = vld [vmem:[%s3162_s4 + $0x124] ss:$12 sps:$4 sm:$0xff]   ;;  %v2403_v12 = vld [vmem:[%s3162_s4 + $0x13c] ss:$12 sps:$4 sm:$0xff]  }
 0x80d   :  { %v740_v13 = vmul.f32 %v738_v9, %v732_v6  ;;  %v739_v14 = vmul.f32 %v735_v10, %v735_v10  ;;  %v2397_v9 = vld [vmem:[%s3162_s4 + $0x120] ss:$12 sps:$4 sm:$0xff]  }
 0x80f   :  { %v742_v15 = vmul.f32 0.044715, %v740_v13  ;;  %v741_v16 = vmul.f32 %v739_v14, %v735_v10  ;;  %v2401_v13 = vld [vmem:[%s3162_s4 + $0x138] ss:$12 sps:$4 sm:$0xff]   ;;  %v2404_v14 = vld [vmem:[%s3162_s4 + $0x140] ss:$12 sps:$4 sm:$0xff]  }
 0x811   :  { %v744_v17 = vadd.f32 %v742_v15, %v732_v6  ;;  %v743_v18 = vmul.f32 0.044715, %v741_v16  ;;  %v2407_v15 = vld [vmem:[%s3162_s4 + $0x154] ss:$12 sps:$4 sm:$0xff]   ;;  %v2405_v16 = vld [vmem:[%s3162_s4 + $0x150] ss:$12 sps:$4 sm:$0xff]  }
 0x813   :  { %v746_v55 = vmul.f32 0.7978846, %v744_v17  ;;  %v745_v19 = vadd.f32 %v743_v18, %v735_v10  ;;  %v2408_v17 = vld [vmem:[%s3162_s4 + $0x158] ss:$12 sps:$4 sm:$0xff]  }
 0x814   :  { %v2411_v18 = vld [vmem:[%s3162_s4 + $0x16c] ss:$12 sps:$4 sm:$0xff]  }
 0x815   :  { %2461 = vtanh.f32 %v746_v55  ;;  %v747_v20 = vmul.f32 0.7978846, %v745_v19  ;;  %v2409_v55 = vld [vmem:[%s3162_s4 + $0x168] ss:$12 sps:$4 sm:$0xff]   ;;  %v2412_v19 = vld [vmem:[%s3162_s4 + $0x170] ss:$12 sps:$4 sm:$0xff]  }
 0x817   :  { %2463 = vtanh.f32 %v747_v20 }
 0x81f   :  { %v2462_v56 = vpop.eup %2461 }
 0x820   :  { %v750_v22 = vadd.f32 1.0, %v2462_v56 }
 0x821   :  { %v2464_v24 = vpop.eup %2463 }
 0x822   :  { %v752_v25 = vmul.f32 0.5, %v750_v22  ;;  %v751_v26 = vadd.f32 1.0, %v2464_v24 }
 0x824   :  { %v753_v27 = vmul.f32 0.5, %v751_v26  ;;  %v754_v28 = vmul.f32 %v752_v25, %v732_v6  ;;  %v2393_v6 = vld [vmem:[%s3162_s4 + $0x108] ss:$12 sps:$4 sm:$0xff]  }
 0x825   :  { %1093 = vmatpush1.bf16.msra.mxu1 %v2393_v6 }
 0x826   :  { %v755_v29 = vmul.f32 %v753_v27, %v735_v10  ;;  %v2400_v10 = vld [vmem:[%s3162_s4 + $0x128] ss:$12 sps:$4 sm:$0xff]   ;;  %1094 = vmatprep.subr.bf16.mxu1 %v2399_v8  ;;  %v894_v27 = vsub.s32 5, %v2727_v58 }
 0x828   :  { %v756_v30 = vpack.c.bf16 %v755_v29, %v754_v28  ;;  %v895_v28 = vrot.slane %v2804_v5, %v894_v27  ;;  %v900_v29 = vsub.s32 6, %v2727_v58 }
 0x829   :  { %1095 = vmatpush1.bf16.msra.mxu1 %v2397_v9 }
 0x82a   :  { %2202 = vmatmul.mubr.bf16.vlgmr.msra.gmra.mrb[8].mxu0 %v756_v30  ;;  %1096 = vmatprep.subr.bf16.mxu1 %v2403_v12 }
 0x82b   :  { %2221 = vmatprep.mubr.msk.bf16.mxu0 %vm2518_vm1, %v2516_v2  ;;  %2206 = vmatpush3.bf16.msra.mxu0 %v2384_v44 }
 0x82c   :  { %2207 = vmatprep.subr.bf16.mxu0 %v2516_v2 }
 0x82d   :  { %1097 = vmatpush1.bf16.msra.mxu1 %v2401_v13 }
 0x82e   :  { %1098 = vmatprep.subr.bf16.mxu1 %v2407_v15 }
 0x82f   :  { %2208 = vmatpush3.bf16.msra.mxu0 %v2388_v46 }
 0x830   :  { %2209 = vmatprep.subr.bf16.mxu0 %v2516_v2 }
 0x831   :  { %1099 = vmatpush1.bf16.msra.mxu1 %v2405_v16 }
 0x832   :  { %1100 = vmatprep.subr.bf16.mxu1 %v2411_v18 }
 0x833   :  { %2210 = vmatpush3.bf16.msra.mxu0 %v2392_v3 }
 0x834   :  { %2211 = vmatprep.subr.bf16.mxu0 %v2516_v2 }
 0x835   :  { %1101 = vmatpush1.bf16.msra.mxu1 %v2409_v55 }
 0x836   :  { %2225 = vmatprep.subr.bf16.mxu1 %v2516_v2 }
 0x837   :  { %2212 = vmatpush3.bf16.msra.mxu0 %v2396_v7 }
 0x838   :  { %2213 = vmatprep.subr.bf16.mxu0 %v2516_v2 }
 0x83b   :  { %2214 = vmatpush3.bf16.msra.mxu0 %v2400_v10 }
 0x83c   :  { %2215 = vmatprep.subr.bf16.mxu0 %v2516_v2 }
 0x83f   :  { %2216 = vmatpush3.bf16.msra.mxu0 %v2404_v14 }
 0x840   :  { %2217 = vmatprep.subr.bf16.mxu0 %v2516_v2 }
 0x843   :  { %2218 = vmatpush3.bf16.msra.mxu0 %v2408_v17 }
 0x844   :  { %2219 = vmatprep.subr.bf16.mxu0 %v2516_v2 }
 0x847   :  { %2220 = vmatpush3.bf16.msra.mxu0 %v2412_v19 }
 0x848   :  { %2257 = vmatprep.subr.bf16.mxu0 %v2516_v2 }
 0x8fd   :  { %v859_v33 = vpop.f32.mrb[8].mxu0 }
 0x8fe   :  { %v860_v34 = vadd.f32 %v859_v33, %v776_v32  ;;  %v2203_v36 = vpop.f32.mrb[9].mxu0 }
 0x8ff   :  { %v862_v37 = vpop.f32.mrb[10].mxu0 }
 0x900   :  { %v863_v38 = vadd.f32 %v862_v37, %v776_v32  ;;  %v2204_v39 = vpop.f32.mrb[11].mxu0  ;;  %v866_v40 = vadd.f32 %v860_v34, %v2847_v49  ;;  %v901_v37 = vrot.slane %v2804_v5, %v900_v29  ;;  %v1933_v5 = vld [vmem:[%s3163_s5 + $0x3] sm:$0x7] }
 0x901   :  { %v946_v42 = vrot.slane %v1933_v5, %v2730_v59  ;;  %v954_v43 = vrot.slane %v1933_v5, %v2733_v60  ;;  %v950_v46 = vrot.slane %v1933_v5, %v2739_v62  ;;  %v2419_v5 = vld [vmem:[%s3164_s6 + $0x70] sm:$0xff]  }
 0x902   :  { %868 = vadd.xlane.f32.xlu0 %v866_v40  ;;  %v867_v41 = vadd.f32 %v863_v38, %v2849_v50 }
 0x904   :  { %870 = vadd.xlane.f32.xlu1 %v867_v41 }
 0x98f   :  { %v869_v48 = vpop.xlane.xlu0 %868 }
 0x990   :  { %v872_v49 = vmul.f32 0.03125, %v869_v48 }
 0x991   :  { %v871_v50 = vpop.xlane.xlu1 %870 }
 0x992   :  { %v874_v51 = vsub.f32 %v866_v40, %v872_v49  ;;  %v873_v52 = vmul.f32 0.03125, %v871_v50 }
 0x994   :  { %v875_v53 = vsub.f32 %v867_v41, %v873_v52  ;;  %v876_v54 = vmul.f32 %v2623_v11, %v874_v51 }
 0x996   :  { %v878_v57 = vmul.f32 %v876_v54, %v876_v54  ;;  %v877_v61 = vmul.f32 %v2623_v11, %v875_v53 }
 0x998   :  { %880 = vadd.xlane.f32.xlu0 %v878_v57  ;;  %v879_v35 = vmul.f32 %v877_v61, %v877_v61 }
 0x99a   :  { %882 = vadd.xlane.f32.xlu1 %v879_v35 }
 0xa25   :  { %v881_v20 = vpop.xlane.xlu0 %880 }
 0xa26   :  { %v884_v56 = vmul.f32 0.03125, %v881_v20 }
 0xa27   :  { %v883_v22 = vpop.xlane.xlu1 %882 }
 0xa28   :  { %v886_v24 = vadd.f32 1e-12, %v884_v56  ;;  %v885_v25 = vmul.f32 0.03125, %v883_v22 }
 0xa2a   :  { %2465 = vrsqrt.f32 %v886_v24  ;;  %v887_v26 = vadd.f32 1e-12, %v885_v25 }
 0xa2c   :  { %2467 = vrsqrt.f32 %v887_v26 }
 0xa34   :  { %v2466_v30 = vpop.eup %2465 }
 0xa35   :  { %v890_v32 = vmul.f32 %v2466_v30, %v876_v54 }
 0xa36   :  { %v2468_v33 = vpop.eup %2467 }
 0xa37   :  { %v891_v34 = vmul.f32 %v2468_v33, %v877_v61  ;;  %v896_v36 = vmul.f32 %v895_v28, %v890_v32  ;;  %v2413_v32 = vld [vmem:[%s3164_s6 + $0x40] sm:$0xff]  }
 0xa39   :  { %v897_v38 = vmul.f32 %v895_v28, %v891_v34  ;;  %v2965_v39 = vadd.f32 %v901_v37, %v896_v36  ;;  %v2414_v34 = vld [vmem:[%s3164_s6 + $0x48] sm:$0xff]   ;;  %v2415_v36 = vld [vmem:[%s3164_s6 + $0x50] sm:$0xff]  }
 0xa3b   :  { %v2967_v40 = vadd.f32 %v901_v37, %v897_v38  ;;  %v2416_v37 = vld [vmem:[%s3164_s6 + $0x58] sm:$0xff]   ;;  %v2417_v38 = vld [vmem:[%s3164_s6 + $0x60] sm:$0xff]  }
 0xa3d   :  { %v904_v41 = vpack.c.bf16 %v2967_v40, %v2965_v39 }
 0xa3f   :  { %1119 = vmatmul.mubr.bf16.vlgmr.msra.gmra.mrb[16].mxu1 %v904_v41  ;;  %2222 = vmatmul.mubr.bf16.vlgmr.msra.gmra.mrb[12].mxu0 %v904_v41  ;;  %v2418_v41 = vld [vmem:[%s3164_s6 + $0x68] sm:$0xff]  }
 0xa40   :  { %2227 = vmatprep.mubr.msk.bf16.mxu1 %vm2518_vm1, %v2516_v2  ;;  %2273 = vmatprep.mubr.msk.bf16.mxu0 %vm2518_vm1, %v2516_v2 }
 0xb12   :  { %v1120_v44 = vpop.f32.mrb[16].mxu1  ;;  %v1163_v45 = vpop.f32.mrb[12].mxu0 }
 0xb13   :  { %v1122_v47 = vpop.f32.mrb[17].mxu1  ;;  %v2223_v48 = vpop.f32.mrb[13].mxu0  ;;  %v1121_v51 = vadd.f32 %v1120_v44, %v946_v42  ;;  %v1164_v52 = vadd.f32 %v1163_v45, %v954_v43 }
 0xb14   :  { %v1124_v49 = vpop.f32.mrb[18].mxu1  ;;  %v1166_v50 = vpop.f32.mrb[14].mxu0  ;;  %v1123_v35 = vadd.f32 %v1122_v47, %v950_v46  ;;  %v3031_v48 = vld [vmem:[%s3165_s7 + $0x8] sm:$0xff] }
 0xb15   :  { %v1125_v53 = vadd.f32 %v1124_v49, %v946_v42  ;;  %v1167_v54 = vadd.f32 %v1166_v50, %v954_v43  ;;  %v1126_v57 = vpop.f32.mrb[19].mxu1  ;;  %v2224_v61 = vpop.f32.mrb[15].mxu0  ;;  %v2420_v42 = vld [vmem:[%s3164_s6 + $0x78] sm:$0xff]   ;;  %v1302_v49 = vrot.slane %v3031_v48, %v2730_v59  ;;  %v2422_v59 = vld [vmem:[%s3166_s8 + $0x48] sm:$0xff]  }
 0xb16   :  { %v1127_v63 = vadd.f32 %v1126_v57, %v950_v46 }
 0xb17   :  { %v1170_v0 = vpack.c.bf16 %v1125_v53, %v1121_v51  ;;  %v1172_v3 = vpack.c.bf16 %v1167_v54, %v1164_v52 }
 0xb18   :  { %v1171_v4 = vpack.c.bf16 %v1127_v63, %v1123_v35  ;;  %v2421_v63 = vld [vmem:[%s3166_s8 + $0x40] sm:$0xff]  }
 0xb19   :  { %2258 = vmatpush3.bf16.msra.mxu0 %v2421_v63 }
 0xb1a   :  { %2226 = vmatpush3.bf16.xpose.msra.mxu1 %v1171_v4  ;;  %2259 = vmatprep.subr.bf16.mxu0 %v2516_v2 }
 0xb1b   :  { %2231 = vmatprep.subr.bf16.mxu1 %v2516_v2 }
 0xb1d   :  { %2260 = vmatpush3.bf16.msra.mxu0 %v2422_v59 }
 0xb1e   :  { %2261 = vmatprep.subr.bf16.mxu0 %v2516_v2 }
 0xb21   :  { %2228 = vmatmul.mubr.bf16.vlgmr.msra.gmra.mrb[20].mxu1 %v1170_v0 }
 0xb22   :  { %2232 = vmatpush3.bf16.msra.mxu1 %v1172_v3  ;;  %2233 = vmatprep.mubr.msk.bf16.mxu1 %vm2518_vm1, %v2516_v2 }
 0xb23   :  { %2237 = vmatprep.subr.bf16.mxu1 %v2516_v2 }
 0xbf4   :  { %v1207_v6 = vpop.f32.mrb[20].mxu1 }
 0xbf5   :  { %v1208_v7 = vadd.f32 %v1207_v6, %v2751_v21  ;;  %v2229_v8 = vpop.f32.mrb[21].mxu1 }
 0xbf6   :  { %v1210_v9 = vpop.f32.mrb[22].mxu1 }
 0xbf7   :  { %v1211_v10 = vadd.f32 %v1210_v9, %v2756_v23  ;;  %v2230_v12 = vpop.f32.mrb[23].mxu1  ;;  %v1214_v13 = vsel %vm412_vm2, %v1208_v7, -inf }
 0xbf8   :  { %1215 = vmax.xlane.f32.xlu0 %v1214_v13  ;;  %v2423_v12 = vld [vmem:[%s3166_s8 + $0x50] sm:$0xff]   ;;  %v2424_v13 = vld [vmem:[%s3166_s8 + $0x58] sm:$0xff]  }
 0xbf9   :  { %v1217_v14 = vsel %vm412_vm2, %v1211_v10, -inf  ;;  %2262 = vmatpush3.bf16.msra.mxu0 %v2423_v12  ;;  %v1580_v12 = vrot.slane %v3031_v48, %v775_v31 }
 0xbfa   :  { %1218 = vmax.xlane.f32.xlu1 %v1217_v14  ;;  %2263 = vmatprep.subr.bf16.mxu0 %v2516_v2  ;;  %v2425_v14 = vld [vmem:[%s3166_s8 + $0x60] sm:$0xff]  }
 0xbfd   :  { %2264 = vmatpush3.bf16.msra.mxu0 %v2424_v13 }
 0xbfe   :  { %2265 = vmatprep.subr.bf16.mxu0 %v2516_v2 }
 0xc01   :  { %2266 = vmatpush3.bf16.msra.mxu0 %v2425_v14 }
 0xc02   :  { %2267 = vmatprep.subr.bf16.mxu0 %v2516_v2 }
 0xc85   :  { %v1216_v15 = vpop.xlane.xlu0 %1215 }
 0xc86   :  { %v1220_v16 = vsub.f32 %v1208_v7, %v1216_v15  ;;  %v2426_v15 = vld [vmem:[%s3166_s8 + $0x68] sm:$0xff]  }
 0xc87   :  { %v1219_v17 = vpop.xlane.xlu1 %1218  ;;  %2268 = vmatpush3.bf16.msra.mxu0 %v2426_v15 }
 0xc88   :  { %v1222_v18 = vmul.f32 1.442695, %v1220_v16  ;;  %v1221_v55 = vsub.f32 %v1211_v10, %v1219_v17  ;;  %2269 = vmatprep.subr.bf16.mxu0 %v2516_v2  ;;  %v2427_v16 = vld [vmem:[%s3166_s8 + $0x70] sm:$0xff]   ;;  %v2428_v17 = vld [vmem:[%s3166_s8 + $0x78] sm:$0xff]  }
 0xc8a   :  { %2469 = vpow2.f32 %v1222_v18  ;;  %v1224_v19 = vmul.f32 1.442695, %v1221_v55 }
 0xc8b   :  { %2270 = vmatpush3.bf16.msra.mxu0 %v2427_v16 }
 0xc8c   :  { %2471 = vpow2.f32 %v1224_v19  ;;  %2271 = vmatprep.subr.bf16.mxu0 %v2516_v2 }
 0xc8f   :  { %2272 = vmatpush3.bf16.msra.mxu0 %v2428_v17 }
 0xc90   :  { %2297 = vmatprep.subr.bf16.mxu0 %v2516_v2 }
 0xc94   :  { %v2470_v21 = vpop.eup %2469 }
 0xc95   :  { %v1226_v20 = vsel %vm412_vm2, %v2470_v21, 0.0 }
 0xc96   :  { %v2472_v56 = vpop.eup %2471  ;;  %1227 = vadd.xlane.f32.xlu0 %v1226_v20 }
 0xc97   :  { %v1229_v23 = vsel %vm412_vm2, %v2472_v56, 0.0 }
 0xc98   :  { %1230 = vadd.xlane.f32.xlu1 %v1229_v23  ;;  %v1421_v23 = vrot.slane %v3031_v48, %v2739_v62  ;;  %v2429_v62 = vld [vmem:[#allocation2 + $0x40] sm:$0xff]  }
 0xd23   :  { %v1228_v22 = vpop.xlane.xlu0 %1227 }
 0xd24   :  { %2473 = vrcp.f32 %v1228_v22 }
 0xd25   :  { %v1231_v24 = vpop.xlane.xlu1 %1230 }
 0xd26   :  { %2475 = vrcp.f32 %v1231_v24 }
 0xd2e   :  { %v2474_v25 = vpop.eup %2473 }
 0xd2f   :  { %v1234_v28 = vmul.f32 %v2474_v25, %v2470_v21 }
 0xd30   :  { %v2476_v26 = vpop.eup %2475 }
 0xd31   :  { %v1235_v30 = vmul.f32 %v2476_v26, %v2472_v56 }
 0xd33   :  { %v1236_v33 = vpack.c.bf16 %v1235_v30, %v1234_v28  ;;  %v1427_v30 = vrot.slane %v3031_v48, %v2733_v60  ;;  %v2431_v60 = vld [vmem:[#allocation2 + $0x50] sm:$0xff]  }
 0xd35   :  { %2234 = vmatmul.mubr.msk.bf16.vlgmr.msra.gmra.mrb[24].mxu1 %vm412_vm2, %v1236_v33 }
 0xd36   :  { %2238 = vmatpush3.bf16.msra.mxu1 %v2413_v32  ;;  %2253 = vmatprep.mubr.msk.bf16.mxu1 %vm2518_vm1, %v2516_v2 }
 0xd37   :  { %2239 = vmatprep.subr.bf16.mxu1 %v2516_v2 }
 0xd3a   :  { %2240 = vmatpush3.bf16.msra.mxu1 %v2414_v34 }
 0xd3b   :  { %2241 = vmatprep.subr.bf16.mxu1 %v2516_v2 }
 0xd3e   :  { %2242 = vmatpush3.bf16.msra.mxu1 %v2415_v36 }
 0xd3f   :  { %2243 = vmatprep.subr.bf16.mxu1 %v2516_v2 }
 0xd42   :  { %2244 = vmatpush3.bf16.msra.mxu1 %v2416_v37  ;;  %v2430_v37 = vld [vmem:[#allocation2 + $0x48] sm:$0xff]  }
 0xd43   :  { %2245 = vmatprep.subr.bf16.mxu1 %v2516_v2 }
 0xd46   :  { %2246 = vmatpush3.bf16.msra.mxu1 %v2417_v38  ;;  %v2432_v38 = vld [vmem:[#allocation2 + $0x58] sm:$0xff]  }
 0xd47   :  { %2247 = vmatprep.subr.bf16.mxu1 %v2516_v2 }
 0xd4a   :  { %2248 = vmatpush3.bf16.msra.mxu1 %v2418_v41  ;;  %v2433_v41 = vld [vmem:[#allocation2 + $0x60] sm:$0xff]  }
 0xd4b   :  { %2249 = vmatprep.subr.bf16.mxu1 %v2516_v2 }
 0xd4e   :  { %2250 = vmatpush3.bf16.msra.mxu1 %v2419_v5  ;;  %v2434_v5 = vld [vmem:[#allocation2 + $0x68] sm:$0xff]  }
 0xd4f   :  { %2251 = vmatprep.subr.bf16.mxu1 %v2516_v2 }
 0xd52   :  { %2252 = vmatpush3.bf16.msra.mxu1 %v2420_v42  ;;  %v2435_v42 = vld [vmem:[#allocation2 + $0x70] sm:$0xff]  }
 0xd53   :  { %2277 = vmatprep.subr.bf16.mxu1 %v2516_v2 }
 0xe08   :  { %v1274_v43 = vpop.f32.mrb[24].mxu1 }
 0xe09   :  { %v2235_v44 = vpop.f32.mrb[25].mxu1 }
 0xe0a   :  { %v1277_v45 = vpop.f32.mrb[26].mxu1  ;;  %v1451_v44 = vrot.slane %v3031_v48, %v647_v1 }
 0xe0b   :  { %v1281_v46 = vpack.c.bf16 %v1277_v45, %v1274_v43  ;;  %v2236_v47 = vpop.f32.mrb[27].mxu1  ;;  %v2436_v43 = vld [vmem:[#allocation2 + $0x78] sm:$0xff]  }
 0xe0d   :  { %2254 = vmatmul.mubr.bf16.vlgmr.msra.gmra.mrb[28].mxu1 %v1281_v46 }
 0xe0e   :  { %2293 = vmatprep.mubr.msk.bf16.mxu1 %vm2518_vm1, %v2516_v2  ;;  %2278 = vmatpush3.bf16.msra.mxu1 %v2429_v62  ;;  %v2441_v62 = vld [vmem:[%s3168_s10 + $0x20] sm:$0xff]  }
 0xe0f   :  { %2279 = vmatprep.subr.bf16.mxu1 %v2516_v2 }
 0xe12   :  { %2280 = vmatpush3.bf16.msra.mxu1 %v2430_v37  ;;  %v2442_v37 = vld [vmem:[%s3168_s10 + $0x28] sm:$0xff]  }
 0xe13   :  { %2281 = vmatprep.subr.bf16.mxu1 %v2516_v2 }
 0xe16   :  { %2282 = vmatpush3.bf16.msra.mxu1 %v2431_v60  ;;  %v2443_v60 = vld [vmem:[%s3168_s10 + $0x30] sm:$0xff]  }
 0xe17   :  { %2283 = vmatprep.subr.bf16.mxu1 %v2516_v2 }
 0xe1a   :  { %2284 = vmatpush3.bf16.msra.mxu1 %v2432_v38  ;;  %v2444_v38 = vld [vmem:[%s3168_s10 + $0x38] sm:$0xff]  }
 0xe1b   :  { %2285 = vmatprep.subr.bf16.mxu1 %v2516_v2 }
 0xe1e   :  { %2286 = vmatpush3.bf16.msra.mxu1 %v2433_v41 }
 0xe1f   :  { %2287 = vmatprep.subr.bf16.mxu1 %v2516_v2 }
 0xe22   :  { %2288 = vmatpush3.bf16.msra.mxu1 %v2434_v5 }
 0xe23   :  { %2289 = vmatprep.subr.bf16.mxu1 %v2516_v2 }
 0xe26   :  { %2290 = vmatpush3.bf16.msra.mxu1 %v2435_v42 }
 0xe27   :  { %2291 = vmatprep.subr.bf16.mxu1 %v2516_v2 }
 0xe2a   :  { %2292 = vmatpush3.bf16.msra.mxu1 %v2436_v43 }
 0xee0   :  { %v1385_v50 = vpop.f32.mrb[28].mxu1 }
 0xee1   :  { %v1386_v51 = vadd.f32 %v1385_v50, %v1302_v49  ;;  %v2255_v52 = vpop.f32.mrb[29].mxu1 }
 0xee2   :  { %v1388_v53 = vpop.f32.mrb[30].mxu1 }
 0xee3   :  { %v1389_v54 = vadd.f32 %v1388_v53, %v1302_v49  ;;  %v2256_v57 = vpop.f32.mrb[31].mxu1  ;;  %v1392_v61 = vadd.f32 %v1386_v51, %v2965_v39 }
 0xee5   :  { %1394 = vadd.xlane.f32.xlu0 %v1392_v61  ;;  %v1393_v35 = vadd.f32 %v1389_v54, %v2967_v40 }
 0xee7   :  { %1396 = vadd.xlane.f32.xlu1 %v1393_v35 }
 0xf72   :  { %v1395_v0 = vpop.xlane.xlu0 %1394 }
 0xf73   :  { %v1398_v39 = vmul.f32 0.03125, %v1395_v0 }
 0xf74   :  { %v1397_v3 = vpop.xlane.xlu1 %1396 }
 0xf75   :  { %v1400_v4 = vsub.f32 %v1392_v61, %v1398_v39  ;;  %v1399_v40 = vmul.f32 0.03125, %v1397_v3 }
 0xf77   :  { %v1401_v6 = vsub.f32 %v1393_v35, %v1399_v40  ;;  %v1402_v7 = vmul.f32 %v2623_v11, %v1400_v4 }
 0xf79   :  { %v1404_v8 = vmul.f32 %v1402_v7, %v1402_v7  ;;  %v1403_v9 = vmul.f32 %v2623_v11, %v1401_v6 }
 0xf7b   :  { %1406 = vadd.xlane.f32.xlu0 %v1404_v8  ;;  %v1405_v10 = vmul.f32 %v1403_v9, %v1403_v9 }
 0xf7d   :  { %1408 = vadd.xlane.f32.xlu1 %v1405_v10 }
0x1008   :  { %v1407_v18 = vpop.xlane.xlu0 %1406 }
0x1009   :  { %v1410_v55 = vmul.f32 0.03125, %v1407_v18 }
0x100a   :  { %v1409_v19 = vpop.xlane.xlu1 %1408 }
0x100b   :  { %v1412_v21 = vadd.f32 1e-12, %v1410_v55  ;;  %v1411_v20 = vmul.f32 0.03125, %v1409_v19 }
0x100d   :  { %2477 = vrsqrt.f32 %v1412_v21  ;;  %v1413_v56 = vadd.f32 1e-12, %v1411_v20  ;;  %v2437_v21 = vld [vmem:[%s3168_s10] sm:$0xff]  }
0x100f   :  { %2479 = vrsqrt.f32 %v1413_v56 }
0x1017   :  { %v2478_v22 = vpop.eup %2477 }
0x1018   :  { %v1416_v24 = vmul.f32 %v2478_v22, %v1402_v7 }
0x1019   :  { %v2480_v25 = vpop.eup %2479 }
0x101a   :  { %v1417_v26 = vmul.f32 %v2480_v25, %v1403_v9  ;;  %v1422_v28 = vmul.f32 %v1421_v23, %v1416_v24 }
0x101c   :  { %v1423_v32 = vmul.f32 %v1421_v23, %v1417_v26  ;;  %v3075_v33 = vadd.f32 %v1427_v30, %v1422_v28 }
0x101e   :  { %v3077_v34 = vadd.f32 %v1427_v30, %v1423_v32  ;;  %v2438_v32 = vld [vmem:[%s3168_s10 + $0x8] sm:$0xff]  }
0x1020   :  { %v1430_v36 = vpack.c.bf16 %v3077_v34, %v3075_v33 }
0x1022   :  { %2274 = vmatmul.mubr.bf16.vlgmr.msra.gmra.mrb[16].mxu0 %v1430_v36  ;;  %v2440_v36 = vld [vmem:[%s3168_s10 + $0x18] sm:$0xff]  }
0x1023   :  { %2313 = vmatprep.mubr.msk.bf16.mxu0 %vm2518_vm1, %v2516_v2  ;;  %2298 = vmatpush3.bf16.msra.mxu0 %v2437_v21 }
0x1024   :  { %2299 = vmatprep.subr.bf16.mxu0 %v2516_v2 }
0x1027   :  { %2300 = vmatpush3.bf16.msra.mxu0 %v2438_v32 }
0x1028   :  { %2301 = vmatprep.subr.bf16.mxu0 %v2516_v2 }
0x10f5   :  { %v1534_v45 = vpop.f32.mrb[16].mxu0 }
0x10f6   :  { %v1535_v46 = vadd.f32 %v1534_v45, %v1451_v44  ;;  %v2275_v47 = vpop.f32.mrb[17].mxu0 }
0x10f7   :  { %v1537_v49 = vpop.f32.mrb[18].mxu0 }
0x10f8   :  { %v1541_v50 = vmul.f32 %v1535_v46, %v1535_v46  ;;  %v1538_v51 = vadd.f32 %v1537_v49, %v1451_v44  ;;  %v2276_v52 = vpop.f32.mrb[19].mxu0 }
0x10fa   :  { %v1543_v53 = vmul.f32 %v1541_v50, %v1535_v46  ;;  %v1542_v54 = vmul.f32 %v1538_v51, %v1538_v51 }
0x10fc   :  { %v1545_v57 = vmul.f32 0.044715, %v1543_v53  ;;  %v1544_v61 = vmul.f32 %v1542_v54, %v1538_v51 }
0x10fe   :  { %v1547_v35 = vadd.f32 %v1545_v57, %v1535_v46  ;;  %v1546_v63 = vmul.f32 0.044715, %v1544_v61 }
0x1100   :  { %v1549_v59 = vmul.f32 0.7978846, %v1547_v35  ;;  %v1548_v0 = vadd.f32 %v1546_v63, %v1538_v51 }
0x1102   :  { %2481 = vtanh.f32 %v1549_v59  ;;  %v1550_v39 = vmul.f32 0.7978846, %v1548_v0 }
0x1104   :  { %2483 = vtanh.f32 %v1550_v39 }
0x110c   :  { %v2482_v3 = vpop.eup %2481 }
0x110d   :  { %v1553_v1 = vadd.f32 1.0, %v2482_v3 }
0x110e   :  { %v2484_v4 = vpop.eup %2483 }
0x110f   :  { %v1555_v40 = vmul.f32 0.5, %v1553_v1  ;;  %v1554_v6 = vadd.f32 1.0, %v2484_v4 }
0x1111   :  { %v1556_v7 = vmul.f32 0.5, %v1554_v6  ;;  %v1557_v8 = vmul.f32 %v1555_v40, %v1535_v46  ;;  %v1699_v46 = vrot.slane %v3031_v48, %v894_v27 }
0x1113   :  { %v1558_v9 = vmul.f32 %v1556_v7, %v1538_v51 }
0x1115   :  { %v1559_v10 = vpack.c.bf16 %v1558_v9, %v1557_v8 }
0x1117   :  { %2294 = vmatmul.mubr.bf16.vlgmr.msra.gmra.mrb[32].mxu1 %v1559_v10 }
0x11ea   :  { %v1663_v13 = vpop.f32.mrb[32].mxu1 }
0x11eb   :  { %v1664_v14 = vadd.f32 %v1663_v13, %v1580_v12  ;;  %v2295_v15 = vpop.f32.mrb[33].mxu1 }
0x11ec   :  { %v1666_v16 = vpop.f32.mrb[34].mxu1 }
0x11ed   :  { %v1667_v17 = vadd.f32 %v1666_v16, %v1580_v12  ;;  %v2296_v18 = vpop.f32.mrb[35].mxu1  ;;  %v1670_v55 = vadd.f32 %v1664_v14, %v3075_v33  ;;  %v1711_v33 = vld [vmem:[%s3160_s2 + $0x8] sm:$0xff] }
0x11ef   :  { %1672 = vadd.xlane.f32.xlu0 %v1670_v55  ;;  %v1671_v19 = vadd.f32 %v1667_v17, %v3077_v34  ;;  %v2439_v34 = vld [vmem:[%s3168_s10 + $0x10] sm:$0xff]  }
0x11f0   :  { %2302 = vmatpush3.bf16.msra.mxu0 %v2439_v34 }
0x11f1   :  { %1674 = vadd.xlane.f32.xlu1 %v1671_v19  ;;  %2303 = vmatprep.subr.bf16.mxu0 %v2516_v2 }
0x11f4   :  { %2304 = vmatpush3.bf16.msra.mxu0 %v2440_v36 }
0x11f5   :  { %2305 = vmatprep.subr.bf16.mxu0 %v2516_v2 }
0x11f8   :  { %2306 = vmatpush3.bf16.msra.mxu0 %v2441_v62 }
0x11f9   :  { %2307 = vmatprep.subr.bf16.mxu0 %v2516_v2 }
0x11fc   :  { %2308 = vmatpush3.bf16.msra.mxu0 %v2442_v37 }
0x11fd   :  { %2309 = vmatprep.subr.bf16.mxu0 %v2516_v2 }
0x1200   :  { %2310 = vmatpush3.bf16.msra.mxu0 %v2443_v60 }
0x1201   :  { %2311 = vmatprep.subr.bf16.mxu0 %v2516_v2  ;;  %v1705_v2 = vrot.slane %v3031_v48, %v900_v29  ;;  %v2015_v29 = vld [vmem:[%s3169_s11] ss:$0 sm:$0xff] }
0x1204   :  { %2312 = vmatpush3.bf16.msra.mxu0 %v2444_v38 }
0x127c   :  { %v1673_v31 = vpop.xlane.xlu0 %1672 }
0x127d   :  { %v1676_v20 = vmul.f32 0.03125, %v1673_v31 }
0x127e   :  { %v1675_v56 = vpop.xlane.xlu1 %1674 }
0x127f   :  { %v1678_v23 = vsub.f32 %v1670_v55, %v1676_v20  ;;  %v1677_v22 = vmul.f32 0.03125, %v1675_v56 }
0x1281   :  { %v1679_v24 = vsub.f32 %v1671_v19, %v1677_v22  ;;  %v1680_v25 = vmul.f32 %v2623_v11, %v1678_v23 }
0x1283   :  { %v1682_v26 = vmul.f32 %v1680_v25, %v1680_v25  ;;  %v1681_v28 = vmul.f32 %v2623_v11, %v1679_v24  ;;  %v1710_v11 = vld [vmem:[%s3160_s2] sm:$0xff] }
0x1285   :  { %1684 = vadd.xlane.f32.xlu0 %v1682_v26  ;;  %v1683_v30 = vmul.f32 %v1681_v28, %v1681_v28 }
0x1287   :  { %1686 = vadd.xlane.f32.xlu1 %v1683_v30 }
0x1298   :  { %1719 = vperm.xlu1 %2324, %v1711_v33  }
0x129b   :  { %1714 = vperm.xlu0 %2323, %v1710_v11  }
0x1312   :  { %v1685_v41 = vpop.xlane.xlu0 %1684 }
0x1313   :  { %v1688_v5 = vmul.f32 0.03125, %v1685_v41 }
0x1314   :  { %v1687_v42 = vpop.xlane.xlu1 %1686 }
0x1315   :  { %v1690_v43 = vadd.f32 1e-12, %v1688_v5  ;;  %v1689_v44 = vmul.f32 0.03125, %v1687_v42 }
0x1317   :  { %2485 = vrsqrt.f32 %v1690_v43  ;;  %v1691_v45 = vadd.f32 1e-12, %v1689_v44 }
0x1318   :  { %v1720_v61 = vpop.permute.xlu1 %1719 }
0x1319   :  { %2487 = vrsqrt.f32 %v1691_v45 }
0x131a   :  { %v1715_v57 = vpop.permute.xlu0 %1714 }
0x1321   :  { %v2486_v47 = vpop.eup %2485 }
0x1322   :  { %v1694_v49 = vmul.f32 %v2486_v47, %v1680_v25 }
0x1323   :  { %v2488_v50 = vpop.eup %2487 }
0x1324   :  { %v1700_v51 = vmul.f32 %v1699_v46, %v1694_v49  ;;  %v1695_v52 = vmul.f32 %v2488_v50, %v1681_v28 }
0x1326   :  { %v1706_v53 = vadd.f32 %v1705_v2, %v1700_v51  ;;  %v1701_v54 = vmul.f32 %v1699_v46, %v1695_v52 }
0x1328   :  { %1708 = vst [vmem:[%s3170_s12] sm:$0xff] %v1706_v53  ;;  %v1707_v35 = vadd.f32 %v1705_v2, %v1701_v54  ;;  %v1722_v63 = vmul.f32 %v1715_v57, %v1706_v53 }
0x132a   :  { %1709 = vst [vmem:[%s3170_s12 + $0x8] sm:$0xff] %v1707_v35  ;;  %v1723_v58 = vmul.f32 %v1720_v61, %v1707_v35 }
0x132c   :  { %v1724_v27 = vpack.c.bf16 %v1723_v58, %v1722_v63 }
0x132e   :  { %2314 = vmatmul.mubr.bf16.vlgmr.msra.gmra.mrb[20].mxu0 %v1724_v27 }
0x1401   :  { %v1830_v48 = vpop.f32.mrb[20].mxu0 }
0x1402   :  { %v1831_v59 = vadd.f32 %v2015_v29, %v1830_v48  ;;  %v2315_v0 = vpop.f32.mrb[21].mxu0 }
0x1403   :  { %v1833_v39 = vpop.f32.mrb[22].mxu0 }
0x1404   :  { %1837 = vst [vmem:[%s3171_s13] sm:$0xff] %v1831_v59  ;;  %v1834_v3 = vadd.f32 %v2015_v29, %v1833_v39  ;;  %v2316_v1 = vpop.f32.mrb[23].mxu0 }
0x1406   :  { %1838 = vst [vmem:[%s3171_s13 + $0x8] sm:$0xff] %v1834_v3 }
0x1407   :  { %1847 = vsyncpa [#allocation3], 1 }

</bundles_post_ra>
